<compile_context>
chip_gen: v7x
topology: tpu7x:2x2x1
jax: 0.10.0
libtpu: 0.0.40
codegen_flags: <defaults>
</compile_context>

<pallas_src>
import jax
import jax.numpy as jnp
from jax.experimental import pallas as pl
from jax.experimental.pallas import tpu as pltpu

_VMEM_LIMIT = 32 * 1024 * 1024  # explicit scoped-VMEM limit (v5e default is only 16 MiB)


# ----------------------------------------------------------------------------
# In-kernel helpers
# ----------------------------------------------------------------------------
def _bilinear_matrix(idx, wt, hw):
    """Build (hw, P) scatter matrix S with S[h, p] = sum_k wt[k, p] * (idx[k, p] == h).

    feat (C, hw) @ S (hw, P) == bilinear point-sampling of all C channels at P
    points -> one MXU matmul (duplicate / zero-weight OOB corners sum correctly)."""
    P = idx.shape[1]
    iota = jax.lax.broadcasted_iota(jnp.int32, (hw, P), 0)
    s = jnp.zeros((hw, P), jnp.float32)
    for k in range(4):  # 4 corners: static unroll of full-width VPU ops
        s = s + jnp.where(iota == idx[k:k + 1, :], wt[k:k + 1, :], 0.0)
    return s


# ----------------------------------------------------------------------------
# Pallas kernels
# ----------------------------------------------------------------------------
def _backbone_kernel(x4_ref, x8_ref, wr_ref, br_ref, wc_ref, bc_ref,
                     res2_ref, coarse_ref):
    # One batch element, channel-major; both 1x1 convs fused in one call.
    #   x4_ref (Cin, H4*W4) f32, x8_ref (Cin, H8*W8) f32
    #   res2_ref (Cr, H4*W4) bf16, coarse_ref (nc, H8*W8) bf16
    r = jnp.dot(wr_ref[...], x4_ref[...], preferred_element_type=jnp.float32)
    res2_ref[...] = jnp.maximum(r + br_ref[...], 0.0).astype(res2_ref.dtype)
    c = jnp.dot(wc_ref[...], x8_ref[...], preferred_element_type=jnp.float32)
    coarse_ref[...] = (c + bc_ref[...]).astype(coarse_ref.dtype)


def _uncertainty_kernel(idx_ref, wt_ref, coarse_ref, unc_ref):
    # Fused point_sample(coarse, over_points) + top-2 uncertainty, one batch element.
    #   idx_ref/wt_ref (4, kN), coarse_ref (nc, HW) bf16, unc_ref (1, kN) f32
    hw = coarse_ref.shape[1]
    s = _bilinear_matrix(idx_ref[...], wt_ref[...], hw)               # (HW, kN)
    vals = jnp.dot(coarse_ref[...].astype(jnp.float32), s,
                   preferred_element_type=jnp.float32)                # (nc, kN)
    nc = vals.shape[0]
    m1 = vals[0:1, :]
    m2 = jnp.full_like(m1, -jnp.inf)
    for ch in range(1, nc):  # streaming top-2 over the small static channel axis (VPU)
        v = vals[ch:ch + 1, :]
        m2 = jnp.maximum(m2, jnp.minimum(m1, v))
        m1 = jnp.maximum(m1, v)
    unc_ref[...] = m2 - m1   # == -(top1 - top2)


def _point_head_kernel(idxc_ref, wtc_ref, idxf_ref, wtf_ref,
                       coarse_ref, res2_ref, wc_ref, wf_ref, b_ref, o_ref):
    # Fused PointHead, one batch element, everything channel-major:
    #   fc = coarse (nc, HWc) @ Sc (HWc, P)   (bilinear sample on the MXU)
    #   ff = res2   (cf, HWf) @ Sf (HWf, P)
    #   rend = Wc @ fc + Wf @ ff + b  -> (num_classes, P)  (lane-dense store)
    sc = _bilinear_matrix(idxc_ref[...], wtc_ref[...], coarse_ref.shape[1])
    sf = _bilinear_matrix(idxf_ref[...], wtf_ref[...], res2_ref.shape[1])
    fc = jnp.dot(coarse_ref[...].astype(jnp.float32), sc,
                 preferred_element_type=jnp.float32)
    ff = jnp.dot(res2_ref[...].astype(jnp.float32), sf,
                 preferred_element_type=jnp.float32)
    rend = (jnp.dot(wc_ref[...], fc, preferred_element_type=jnp.float32)
            + jnp.dot(wf_ref[...], ff, preferred_element_type=jnp.float32)
            + b_ref[...])
    o_ref[...] = rend.astype(o_ref.dtype)


# ----------------------------------------------------------------------------
# BlockSpec helpers
# ----------------------------------------------------------------------------
def _batch_spec(shape):
    # One batch element per grid step; leading batch dim squeezed out of the ref.
    return pl.BlockSpec((None,) + tuple(shape), lambda b: (b, 0, 0))


def _shared_spec(shape):
    # Weights / biases shared across all grid steps.
    return pl.BlockSpec(tuple(shape), lambda b: (0, 0))


# ----------------------------------------------------------------------------
# Bilinear corner precompute (index math only, JAX glue)
# ----------------------------------------------------------------------------
def _bilinear_corners(points, H, W):
    """Corner linear indices + weights matching
    F.grid_sample(feat, 2*points-1, mode='bilinear', padding_mode='zeros',
                  align_corners=False); points in [0,1], last dim (x, y).
    Returns idx int32 (B, 4, P) and wt f32 (B, 4, P) (P on the lane axis)."""
    pts = points.astype(jnp.float32)
    px = pts[..., 0] * W - 0.5
    py = pts[..., 1] * H - 0.5
    x0 = jnp.floor(px)
    y0 = jnp.floor(py)
    fx = px - x0
    fy = py - y0
    x0 = x0.astype(jnp.int32)
    y0 = y0.astype(jnp.int32)
    idxs, wts = [], []
    for dy, wy in ((0, 1.0 - fy), (1, fy)):
        for dx, wx in ((0, 1.0 - fx), (1, fx)):
            xi = x0 + dx
            yi = y0 + dy
            valid = ((xi >= 0) & (xi < W) & (yi >= 0) & (yi < H)).astype(jnp.float32)
            wts.append(wx * wy * valid)
            idxs.append(jnp.clip(yi, 0, H - 1) * W + jnp.clip(xi, 0, W - 1))
    return (jnp.stack(idxs, axis=1).astype(jnp.int32),
            jnp.stack(wts, axis=1).astype(jnp.float32))


# ----------------------------------------------------------------------------
# Backbone
# ----------------------------------------------------------------------------
def backbone_forward(p, x):
    B, C, H, W = x.shape
    H4, W4, H8, W8 = H // 4, W // 4, H // 8, W // 8
    cr = p["res2_w"].shape[0]
    nc = p["coarse_w"].shape[0]
    # Pooling by XLA reshape+mean directly on NCHW: reads x exactly once and
    # needs no full-resolution transpose (per-batch NCHW is already (C, H*W)).
    x4 = x.reshape(B, C, H4, 4, W4, 4).mean(axis=(3, 5))
    x8 = x4.reshape(B, C, H8, 2, W8, 2).mean(axis=(3, 5))   # avg of avg == 8x8 avg
    res2_cm, coarse_cm = pl.pallas_call(
        _backbone_kernel,
        out_shape=(jax.ShapeDtypeStruct((B, cr, H4 * W4), jnp.bfloat16),
                   jax.ShapeDtypeStruct((B, nc, H8 * W8), jnp.bfloat16)),
        grid=(B,),
        in_specs=[
            _batch_spec((C, H4 * W4)),
            _batch_spec((C, H8 * W8)),
            _shared_spec((cr, C)),
            _shared_spec((cr, 1)),
            _shared_spec((nc, C)),
            _shared_spec((nc, 1)),
        ],
        out_specs=(_batch_spec((cr, H4 * W4)), _batch_spec((nc, H8 * W8))),
        compiler_params=pltpu.CompilerParams(
            dimension_semantics=("parallel",),   # B >= 2 -> both v7x TCs get work
            vmem_limit_bytes=_VMEM_LIMIT),
    )(
        x4.reshape(B, C, H4 * W4),
        x8.reshape(B, C, H8 * W8),
        p["res2_w"].astype(jnp.float32),
        p["res2_b"].reshape(cr, 1).astype(jnp.float32),
        p["coarse_w"].astype(jnp.float32),
        p["coarse_b"].reshape(nc, 1).astype(jnp.float32),
    )
    # Free reshapes back to NCHW views (bf16 feature maps, per the perf review).
    return {"res2": res2_cm.reshape(B, cr, H4, W4),
            "coarse": coarse_cm.reshape(B, nc, H8, W8)}


# ----------------------------------------------------------------------------
# PointHead
# ----------------------------------------------------------------------------
def point_uncertainty(coarse_cm, points, H, W):
    """Sample all coarse channels at `points` and return -(top1 - top2) per point."""
    B, nc, HW = coarse_cm.shape
    P = points.shape[1]
    idx, wt = _bilinear_corners(points, H, W)
    unc = pl.pallas_call(
        _uncertainty_kernel,
        out_shape=jax.ShapeDtypeStruct((B, 1, P), jnp.float32),
        grid=(B,),
        in_specs=[_batch_spec((4, P)), _batch_spec((4, P)), _batch_spec((nc, HW))],
        out_specs=_batch_spec((1, P)),
        compiler_params=pltpu.CompilerParams(
            dimension_semantics=("parallel",), vmem_limit_bytes=_VMEM_LIMIT),
    )(idx, wt, coarse_cm)
    return unc[:, 0, :]


def sampling_points(coarse_cm, H8, W8, N, k, beta, key):
    """PointRend training-path sampling_points.

    Uncertainty is computed by bilinearly sampling ALL channel logits at each
    over-generated point and taking the top-2 gap of the sampled values (the
    per-pixel-sort-first variant differs only where the argmax channel changes
    across the 4 neighbouring coarse pixels)."""
    B, nc, _ = coarse_cm.shape
    n_imp = int(beta * N)
    assert nc >= 2 and 0 < n_imp < N
    k1, k2 = jax.random.split(key)
    over = jax.random.uniform(k1, (B, k * N, 2), dtype=jnp.float32)
    unc = point_uncertainty(coarse_cm, over, H8, W8)        # (B, kN), Pallas
    # TODO(synk): top-k point selection has no clean Pallas equivalent; lax.top_k.
    _, sel = jax.lax.top_k(unc, n_imp)
    importance = jnp.take_along_axis(over, sel[..., None], axis=1)
    coverage = jax.random.uniform(k2, (B, N - n_imp, 2), dtype=jnp.float32)
    return jnp.concatenate([importance, coverage], axis=1)


def fused_point_head(coarse_cm, res2_cm, points, w_mlp, b_mlp, hw_c, hw_f):
    """Sample coarse & fine features at `points` and apply the 1x1 MLP inside a
    single pallas_call.  Returns rend (B, num_classes, P) directly (lane-dense)."""
    B, nc, HWc = coarse_cm.shape
    _, cf, HWf = res2_cm.shape
    P = points.shape[1]
    nco = w_mlp.shape[0]
    idx_c, wt_c = _bilinear_corners(points, *hw_c)
    idx_f, wt_f = _bilinear_corners(points, *hw_f)
    # TODO(synk): for non-toy feature maps, switch coarse/res2 here to
    # memory_space=pl.ANY + gather-DMA of only the 4*P corner rows (full
    # per-batch (C, HW) blocks would not fit v7x's 64 MiB VMEM at real sizes).
    return pl.pallas_call(
        _point_head_kernel,
        out_shape=jax.ShapeDtypeStruct((B, nco, P), jnp.float32),
        grid=(B,),
        in_specs=[
            _batch_spec((4, P)), _batch_spec((4, P)),          # coarse corners
            _batch_spec((4, P)), _batch_spec((4, P)),          # res2 corners
            _batch_spec((nc, HWc)), _batch_spec((cf, HWf)),    # bf16 feature maps
            _shared_spec((nco, nc)), _shared_spec((nco, cf)),  # split MLP weights
            _shared_spec((nco, 1)),
        ],
        out_specs=_batch_spec((nco, P)),
        compiler_params=pltpu.CompilerParams(
            dimension_semantics=("parallel",), vmem_limit_bytes=_VMEM_LIMIT),
    )(idx_c, wt_c, idx_f, wt_f, coarse_cm, res2_cm,
      w_mlp[:, :nc].astype(jnp.float32), w_mlp[:, nc:].astype(jnp.float32),
      b_mlp.reshape(nco, 1).astype(jnp.float32))


def point_head_forward(p, x, res2, coarse, key, k=3, beta=0.75):
    B, nc, H8, W8 = coarse.shape
    _, cf, H4, W4 = res2.shape
    N = x.shape[-1] // 16
    # Free views: per-batch NCHW is already channel-major (C, H*W).
    coarse_cm = coarse.reshape(B, nc, H8 * W8)
    res2_cm = res2.reshape(B, cf, H4 * W4)
    points = sampling_points(coarse_cm, H8, W8, N, k, beta, key)
    rend = fused_point_head(coarse_cm, res2_cm, points, p["mlp_w"], p["mlp_b"],
                            (H8, W8), (H4, W4))
    return {"rend": rend, "points": points}


def pointrend_forward(params, x, key):
    result = backbone_forward(params["backbone"], x)
    result.update(
        point_head_forward(params["head"], x, result["res2"], result["coarse"], key)
    )
    return result


# ----------------------------------------------------------------------------
# Main
# ----------------------------------------------------------------------------
if __name__ == "__main__":
    C_in, C_res2, num_classes = 4, 8, 3
    B, H, W = 2, 64, 64

    key = jax.random.PRNGKey(0)
    ks = jax.random.split(key, 8)
    params = {
        "backbone": {
            "res2_w": 0.1 * jax.random.normal(ks[0], (C_res2, C_in), jnp.float32),
            "res2_b": 0.1 * jax.random.normal(ks[1], (C_res2,), jnp.float32),
            "coarse_w": 0.1 * jax.random.normal(ks[2], (num_classes, C_in), jnp.float32),
            "coarse_b": 0.1 * jax.random.normal(ks[3], (num_classes,), jnp.float32),
        },
        "head": {
            "mlp_w": 0.1
            * jax.random.normal(ks[4], (num_classes, num_classes + C_res2), jnp.float32),
            "mlp_b": 0.1 * jax.random.normal(ks[5], (num_classes,), jnp.float32),
        },
    }
    x = jax.random.normal(ks[6], (B, C_in, H, W), jnp.float32)
    sample_key = ks[7]

    fwd = jax.jit(pointrend_forward)
    result = fwd(params, x, sample_key)
    jax.block_until_ready(result)

    assert result["res2"].shape == (B, C_res2, H // 4, W // 4)
    assert result["coarse"].shape == (B, num_classes, H // 8, W // 8)
    assert result["rend"].shape == (B, num_classes, W // 16)
    assert result["points"].shape == (B, W // 16, 2)
    print("KERNEL_OK")
</pallas_src>

<mosaic_0001>
module attributes {stable_mosaic.version = 11 : i64} {
  func.func @_backbone_kernel(%arg0: i32, %arg1: memref<1x4x256xf32, #tpu.memory_space<vmem>>, %arg2: memref<1x4x64xf32, #tpu.memory_space<vmem>>, %arg3: memref<8x4xf32, #tpu.memory_space<vmem>>, %arg4: memref<8x1xf32, #tpu.memory_space<vmem>>, %arg5: memref<3x4xf32, #tpu.memory_space<vmem>>, %arg6: memref<3x1xf32, #tpu.memory_space<vmem>>, %arg7: memref<1x8x256xbf16, #tpu.memory_space<vmem>>, %arg8: memref<1x3x64xbf16, #tpu.memory_space<vmem>>) attributes {dimension_semantics = [#tpu.dimension_semantics<parallel>], iteration_bounds = array<i64: 2>, scalar_prefetch = 0 : i64, scratch_operands = 0 : i64, tpu.core_type = #tpu.core_type<tc>, window_params = [{transform_indices = @transform_0, window_bounds = array<i64: 1, 4, 256>}, {transform_indices = @transform_1, window_bounds = array<i64: 1, 4, 64>}, {pipeline_mode = #tpu.pipeline_mode<synchronous>, transform_indices = @transform_2, window_bounds = array<i64: 8, 4>}, {pipeline_mode = #tpu.pipeline_mode<synchronous>, transform_indices = @transform_3, window_bounds = array<i64: 8, 1>}, {pipeline_mode = #tpu.pipeline_mode<synchronous>, transform_indices = @transform_4, window_bounds = array<i64: 3, 4>}, {pipeline_mode = #tpu.pipeline_mode<synchronous>, transform_indices = @transform_5, window_bounds = array<i64: 3, 1>}, {transform_indices = @transform_6, window_bounds = array<i64: 1, 8, 256>}, {transform_indices = @transform_7, window_bounds = array<i64: 1, 3, 64>}]} {
    %c0 = arith.constant 0 : index
    %c0_0 = arith.constant 0 : index
    %0 = vector.load %arg3[%c0, %c0_0] : memref<8x4xf32, #tpu.memory_space<vmem>>, vector<8x4xf32>
    %c0_1 = arith.constant 0 : index
    %c0_2 = arith.constant 0 : index
    %c0_3 = arith.constant 0 : index
    %1 = vector.load %arg1[%c0_1, %c0_2, %c0_3] : memref<1x4x256xf32, #tpu.memory_space<vmem>>, vector<1x4x256xf32>
    %2 = vector.shape_cast %1 : vector<1x4x256xf32> to vector<4x256xf32>
    %cst = arith.constant dense<0.000000e+00> : vector<8x256xf32>
    %3 = tpu.matmul %0, %2, %cst {dimension_numbers = #tpu.dot_dimension_numbers<[1], [0], [0], [1], [0, 0, 1, 1], [], []>} : vector<8x4xf32>, vector<4x256xf32>, vector<8x256xf32> -> vector<8x256xf32>
    %c0_4 = arith.constant 0 : index
    %c0_5 = arith.constant 0 : index
    %4 = vector.load %arg4[%c0_4, %c0_5] : memref<8x1xf32, #tpu.memory_space<vmem>>, vector<8x1xf32>
    %5 = vector.broadcast %4 : vector<8x1xf32> to vector<8x256xf32>
    %6 = arith.addf %3, %5 : vector<8x256xf32>
    %cst_6 = arith.constant 0.000000e+00 : f32
    %7 = vector.broadcast %cst_6 : f32 to vector<8x256xf32>
    %8 = arith.maximumf %6, %7 : vector<8x256xf32>
    %9 = arith.truncf %8 : vector<8x256xf32> to vector<8x256xbf16>
    %c0_7 = arith.constant 0 : index
    %c0_8 = arith.constant 0 : index
    %c0_9 = arith.constant 0 : index
    %10 = vector.load %arg7[%c0_7, %c0_8, %c0_9] : memref<1x8x256xbf16, #tpu.memory_space<vmem>>, vector<1x8x256xbf16>
    %11 = vector.shape_cast %10 : vector<1x8x256xbf16> to vector<8x256xbf16>
    %12 = vector.shape_cast %9 : vector<8x256xbf16> to vector<1x8x256xbf16>
    tpu.vector_store %arg7[%c0_7, %c0_8, %c0_9], %12 {strides = array<i32>} : memref<1x8x256xbf16, #tpu.memory_space<vmem>>, vector<1x8x256xbf16>,
    %c0_10 = arith.constant 0 : index
    %c0_11 = arith.constant 0 : index
    %13 = vector.load %arg5[%c0_10, %c0_11] : memref<3x4xf32, #tpu.memory_space<vmem>>, vector<3x4xf32>
    %c0_12 = arith.constant 0 : index
    %c0_13 = arith.constant 0 : index
    %c0_14 = arith.constant 0 : index
    %14 = vector.load %arg2[%c0_12, %c0_13, %c0_14] : memref<1x4x64xf32, #tpu.memory_space<vmem>>, vector<1x4x64xf32>
    %15 = vector.shape_cast %14 : vector<1x4x64xf32> to vector<4x64xf32>
    %cst_15 = arith.constant dense<0.000000e+00> : vector<3x64xf32>
    %16 = tpu.matmul %13, %15, %cst_15 {dimension_numbers = #tpu.dot_dimension_numbers<[1], [0], [0], [1], [0, 0, 1, 1], [], []>} : vector<3x4xf32>, vector<4x64xf32>, vector<3x64xf32> -> vector<3x64xf32>
    %c0_16 = arith.constant 0 : index
    %c0_17 = arith.constant 0 : index
    %17 = vector.load %arg6[%c0_16, %c0_17] : memref<3x1xf32, #tpu.memory_space<vmem>>, vector<3x1xf32>
    %18 = vector.broadcast %17 : vector<3x1xf32> to vector<3x64xf32>
    %19 = arith.addf %16, %18 : vector<3x64xf32>
    %20 = arith.truncf %19 : vector<3x64xf32> to vector<3x64xbf16>
    %c0_18 = arith.constant 0 : index
    %c0_19 = arith.constant 0 : index
    %c0_20 = arith.constant 0 : index
    %21 = vector.load %arg8[%c0_18, %c0_19, %c0_20] : memref<1x3x64xbf16, #tpu.memory_space<vmem>>, vector<1x3x64xbf16>
    %22 = vector.shape_cast %21 : vector<1x3x64xbf16> to vector<3x64xbf16>
    %23 = vector.shape_cast %20 : vector<3x64xbf16> to vector<1x3x64xbf16>
    tpu.vector_store %arg8[%c0_18, %c0_19, %c0_20], %23 {strides = array<i32>} : memref<1x3x64xbf16, #tpu.memory_space<vmem>>, vector<1x3x64xbf16>,
    return
  }
  func.func @transform_0(%arg0: i32) -> (i32, i32, i32) {
    %c0_i32 = arith.constant 0 : i32
    %c0_i32_0 = arith.constant 0 : i32
    %c0_i32_1 = arith.constant 0 : i32
    return %arg0, %c0_i32, %c0_i32_0 : i32, i32, i32
  }
  func.func @transform_1(%arg0: i32) -> (i32, i32, i32) {
    %c0_i32 = arith.constant 0 : i32
    %c0_i32_0 = arith.constant 0 : i32
    %c0_i32_1 = arith.constant 0 : i32
    return %arg0, %c0_i32, %c0_i32_0 : i32, i32, i32
  }
  func.func @transform_2(%arg0: i32) -> (i32, i32) {
    %c0_i32 = arith.constant 0 : i32
    %c0_i32_0 = arith.constant 0 : i32
    %c0_i32_1 = arith.constant 0 : i32
    return %c0_i32, %c0_i32_0 : i32, i32
  }
  func.func @transform_3(%arg0: i32) -> (i32, i32) {
    %c0_i32 = arith.constant 0 : i32
    %c0_i32_0 = arith.constant 0 : i32
    %c0_i32_1 = arith.constant 0 : i32
    return %c0_i32, %c0_i32_0 : i32, i32
  }
  func.func @transform_4(%arg0: i32) -> (i32, i32) {
    %c0_i32 = arith.constant 0 : i32
    %c0_i32_0 = arith.constant 0 : i32
    %c0_i32_1 = arith.constant 0 : i32
    return %c0_i32, %c0_i32_0 : i32, i32
  }
  func.func @transform_5(%arg0: i32) -> (i32, i32) {
    %c0_i32 = arith.constant 0 : i32
    %c0_i32_0 = arith.constant 0 : i32
    %c0_i32_1 = arith.constant 0 : i32
    return %c0_i32, %c0_i32_0 : i32, i32
  }
  func.func @transform_6(%arg0: i32) -> (i32, i32, i32) {
    %c0_i32 = arith.constant 0 : i32
    %c0_i32_0 = arith.constant 0 : i32
    %c0_i32_1 = arith.constant 0 : i32
    return %arg0, %c0_i32, %c0_i32_0 : i32, i32, i32
  }
  func.func @transform_7(%arg0: i32) -> (i32, i32, i32) {
    %c0_i32 = arith.constant 0 : i32
    %c0_i32_0 = arith.constant 0 : i32
    %c0_i32_1 = arith.constant 0 : i32
    return %arg0, %c0_i32, %c0_i32_0 : i32, i32, i32
  }
}

module attributes {stable_mosaic.version = 11 : i64} {
  func.func @_uncertainty_kernel(%arg0: i32, %arg1: memref<1x4x12xi32, #tpu.memory_space<vmem>>, %arg2: memref<1x4x12xf32, #tpu.memory_space<vmem>>, %arg3: memref<1x3x64xbf16, #tpu.memory_space<vmem>>, %arg4: memref<1x1x12xf32, #tpu.memory_space<vmem>>) attributes {dimension_semantics = [#tpu.dimension_semantics<parallel>], iteration_bounds = array<i64: 2>, scalar_prefetch = 0 : i64, scratch_operands = 0 : i64, tpu.core_type = #tpu.core_type<tc>, window_params = [{transform_indices = @transform_0, window_bounds = array<i64: 1, 4, 12>}, {transform_indices = @transform_1, window_bounds = array<i64: 1, 4, 12>}, {transform_indices = @transform_2, window_bounds = array<i64: 1, 3, 64>}, {transform_indices = @transform_3, window_bounds = array<i64: 1, 1, 12>}]} {
    %c0 = arith.constant 0 : index
    %c0_0 = arith.constant 0 : index
    %c0_1 = arith.constant 0 : index
    %0 = vector.load %arg1[%c0, %c0_0, %c0_1] : memref<1x4x12xi32, #tpu.memory_space<vmem>>, vector<1x4x12xi32>
    %1 = vector.shape_cast %0 : vector<1x4x12xi32> to vector<4x12xi32>
    %c0_2 = arith.constant 0 : index
    %c0_3 = arith.constant 0 : index
    %c0_4 = arith.constant 0 : index
    %2 = vector.load %arg2[%c0_2, %c0_3, %c0_4] : memref<1x4x12xf32, #tpu.memory_space<vmem>>, vector<1x4x12xf32>
    %3 = vector.shape_cast %2 : vector<1x4x12xf32> to vector<4x12xf32>
    %4 = tpu.iota {dimensions = array<i32: 0>} : vector<64x12xi32>
    %cst = arith.constant 0.000000e+00 : f32
    %5 = vector.broadcast %cst : f32 to vector<64x12xf32>
    %6 = vector.extract_strided_slice %1 {offsets = [0, 0], sizes = [1, 12], strides = [1, 1]} : vector<4x12xi32> to vector<1x12xi32>
    %7 = vector.broadcast %6 : vector<1x12xi32> to vector<64x12xi32>
    %8 = arith.cmpi eq, %4, %7 : vector<64x12xi32>
    %9 = vector.extract_strided_slice %3 {offsets = [0, 0], sizes = [1, 12], strides = [1, 1]} : vector<4x12xf32> to vector<1x12xf32>
    %cst_5 = arith.constant 0.000000e+00 : f32
    %10 = vector.shape_cast %9 : vector<1x12xf32> to vector<1x12xf32>
    %11 = vector.broadcast %10 : vector<1x12xf32> to vector<64x12xf32>
    %12 = vector.broadcast %cst_5 : f32 to vector<64x12xf32>
    %13 = arith.select %8, %11, %12 : vector<64x12xi1>, vector<64x12xf32>
    %14 = arith.addf %5, %13 : vector<64x12xf32>
    %15 = vector.extract_strided_slice %1 {offsets = [1, 0], sizes = [1, 12], strides = [1, 1]} : vector<4x12xi32> to vector<1x12xi32>
    %16 = vector.broadcast %15 : vector<1x12xi32> to vector<64x12xi32>
    %17 = arith.cmpi eq, %4, %16 : vector<64x12xi32>
    %18 = vector.extract_strided_slice %3 {offsets = [1, 0], sizes = [1, 12], strides = [1, 1]} : vector<4x12xf32> to vector<1x12xf32>
    %cst_6 = arith.constant 0.000000e+00 : f32
    %19 = vector.shape_cast %18 : vector<1x12xf32> to vector<1x12xf32>
    %20 = vector.broadcast %19 : vector<1x12xf32> to vector<64x12xf32>
    %21 = vector.broadcast %cst_6 : f32 to vector<64x12xf32>
    %22 = arith.select %17, %20, %21 : vector<64x12xi1>, vector<64x12xf32>
    %23 = arith.addf %14, %22 : vector<64x12xf32>
    %24 = vector.extract_strided_slice %1 {offsets = [2, 0], sizes = [1, 12], strides = [1, 1]} : vector<4x12xi32> to vector<1x12xi32>
    %25 = vector.broadcast %24 : vector<1x12xi32> to vector<64x12xi32>
    %26 = arith.cmpi eq, %4, %25 : vector<64x12xi32>
    %27 = vector.extract_strided_slice %3 {offsets = [2, 0], sizes = [1, 12], strides = [1, 1]} : vector<4x12xf32> to vector<1x12xf32>
    %cst_7 = arith.constant 0.000000e+00 : f32
    %28 = vector.shape_cast %27 : vector<1x12xf32> to vector<1x12xf32>
    %29 = vector.broadcast %28 : vector<1x12xf32> to vector<64x12xf32>
    %30 = vector.broadcast %cst_7 : f32 to vector<64x12xf32>
    %31 = arith.select %26, %29, %30 : vector<64x12xi1>, vector<64x12xf32>
    %32 = arith.addf %23, %31 : vector<64x12xf32>
    %33 = vector.extract_strided_slice %1 {offsets = [3, 0], sizes = [1, 12], strides = [1, 1]} : vector<4x12xi32> to vector<1x12xi32>
    %34 = vector.broadcast %33 : vector<1x12xi32> to vector<64x12xi32>
    %35 = arith.cmpi eq, %4, %34 : vector<64x12xi32>
    %36 = vector.extract_strided_slice %3 {offsets = [3, 0], sizes = [1, 12], strides = [1, 1]} : vector<4x12xf32> to vector<1x12xf32>
    %cst_8 = arith.constant 0.000000e+00 : f32
    %37 = vector.shape_cast %36 : vector<1x12xf32> to vector<1x12xf32>
    %38 = vector.broadcast %37 : vector<1x12xf32> to vector<64x12xf32>
    %39 = vector.broadcast %cst_8 : f32 to vector<64x12xf32>
    %40 = arith.select %35, %38, %39 : vector<64x12xi1>, vector<64x12xf32>
    %41 = arith.addf %32, %40 : vector<64x12xf32>
    %c0_9 = arith.constant 0 : index
    %c0_10 = arith.constant 0 : index
    %c0_11 = arith.constant 0 : index
    %42 = vector.load %arg3[%c0_9, %c0_10, %c0_11] : memref<1x3x64xbf16, #tpu.memory_space<vmem>>, vector<1x3x64xbf16>
    %43 = vector.shape_cast %42 : vector<1x3x64xbf16> to vector<3x64xbf16>
    %44 = arith.extf %43 : vector<3x64xbf16> to vector<3x64xf32>
    %cst_12 = arith.constant dense<0.000000e+00> : vector<3x12xf32>
    %45 = tpu.matmul %44, %41, %cst_12 {dimension_numbers = #tpu.dot_dimension_numbers<[1], [0], [0], [1], [0, 0, 1, 1], [], []>} : vector<3x64xf32>, vector<64x12xf32>, vector<3x12xf32> -> vector<3x12xf32>
    %46 = vector.extract_strided_slice %45 {offsets = [0, 0], sizes = [1, 12], strides = [1, 1]} : vector<3x12xf32> to vector<1x12xf32>
    %cst_13 = arith.constant 0xFF800000 : f32
    %47 = vector.broadcast %cst_13 : f32 to vector<1x12xf32>
    %48 = vector.extract_strided_slice %45 {offsets = [1, 0], sizes = [1, 12], strides = [1, 1]} : vector<3x12xf32> to vector<1x12xf32>
    %49 = arith.minimumf %46, %48 : vector<1x12xf32>
    %50 = arith.maximumf %47, %49 : vector<1x12xf32>
    %51 = arith.maximumf %46, %48 : vector<1x12xf32>
    %52 = vector.extract_strided_slice %45 {offsets = [2, 0], sizes = [1, 12], strides = [1, 1]} : vector<3x12xf32> to vector<1x12xf32>
    %53 = arith.minimumf %51, %52 : vector<1x12xf32>
    %54 = arith.maximumf %50, %53 : vector<1x12xf32>
    %55 = arith.maximumf %51, %52 : vector<1x12xf32>
    %56 = arith.subf %54, %55 : vector<1x12xf32>
    %c0_14 = arith.constant 0 : index
    %c0_15 = arith.constant 0 : index
    %c0_16 = arith.constant 0 : index
    %57 = vector.load %arg4[%c0_14, %c0_15, %c0_16] : memref<1x1x12xf32, #tpu.memory_space<vmem>>, vector<1x1x12xf32>
    %58 = vector.shape_cast %57 : vector<1x1x12xf32> to vector<1x12xf32>
    %59 = vector.shape_cast %56 : vector<1x12xf32> to vector<1x1x12xf32>
    tpu.vector_store %arg4[%c0_14, %c0_15, %c0_16], %59 {strides = array<i32>} : memref<1x1x12xf32, #tpu.memory_space<vmem>>, vector<1x1x12xf32>,
    return
  }
  func.func @transform_0(%arg0: i32) -> (i32, i32, i32) {
    %c0_i32 = arith.constant 0 : i32
    %c0_i32_0 = arith.constant 0 : i32
    %c0_i32_1 = arith.constant 0 : i32
    return %arg0, %c0_i32, %c0_i32_0 : i32, i32, i32
  }
  func.func @transform_1(%arg0: i32) -> (i32, i32, i32) {
    %c0_i32 = arith.constant 0 : i32
    %c0_i32_0 = arith.constant 0 : i32
    %c0_i32_1 = arith.constant 0 : i32
    return %arg0, %c0_i32, %c0_i32_0 : i32, i32, i32
  }
  func.func @transform_2(%arg0: i32) -> (i32, i32, i32) {
    %c0_i32 = arith.constant 0 : i32
    %c0_i32_0 = arith.constant 0 : i32
    %c0_i32_1 = arith.constant 0 : i32
    return %arg0, %c0_i32, %c0_i32_0 : i32, i32, i32
  }
  func.func @transform_3(%arg0: i32) -> (i32, i32, i32) {
    %c0_i32 = arith.constant 0 : i32
    %c0_i32_0 = arith.constant 0 : i32
    %c0_i32_1 = arith.constant 0 : i32
    return %arg0, %c0_i32, %c0_i32_0 : i32, i32, i32
  }
}

module attributes {stable_mosaic.version = 11 : i64} {
  func.func @_point_head_kernel(%arg0: i32, %arg1: memref<1x4x4xi32, #tpu.memory_space<vmem>>, %arg2: memref<1x4x4xf32, #tpu.memory_space<vmem>>, %arg3: memref<1x4x4xi32, #tpu.memory_space<vmem>>, %arg4: memref<1x4x4xf32, #tpu.memory_space<vmem>>, %arg5: memref<1x3x64xbf16, #tpu.memory_space<vmem>>, %arg6: memref<1x8x256xbf16, #tpu.memory_space<vmem>>, %arg7: memref<3x3xf32, #tpu.memory_space<vmem>>, %arg8: memref<3x8xf32, #tpu.memory_space<vmem>>, %arg9: memref<3x1xf32, #tpu.memory_space<vmem>>, %arg10: memref<1x3x4xf32, #tpu.memory_space<vmem>>) attributes {dimension_semantics = [#tpu.dimension_semantics<parallel>], iteration_bounds = array<i64: 2>, scalar_prefetch = 0 : i64, scratch_operands = 0 : i64, tpu.core_type = #tpu.core_type<tc>, window_params = [{transform_indices = @transform_0, window_bounds = array<i64: 1, 4, 4>}, {transform_indices = @transform_1, window_bounds = array<i64: 1, 4, 4>}, {transform_indices = @transform_2, window_bounds = array<i64: 1, 4, 4>}, {transform_indices = @transform_3, window_bounds = array<i64: 1, 4, 4>}, {transform_indices = @transform_4, window_bounds = array<i64: 1, 3, 64>}, {transform_indices = @transform_5, window_bounds = array<i64: 1, 8, 256>}, {pipeline_mode = #tpu.pipeline_mode<synchronous>, transform_indices = @transform_6, window_bounds = array<i64: 3, 3>}, {pipeline_mode = #tpu.pipeline_mode<synchronous>, transform_indices = @transform_7, window_bounds = array<i64: 3, 8>}, {pipeline_mode = #tpu.pipeline_mode<synchronous>, transform_indices = @transform_8, window_bounds = array<i64: 3, 1>}, {transform_indices = @transform_9, window_bounds = array<i64: 1, 3, 4>}]} {
    %c0 = arith.constant 0 : index
    %c0_0 = arith.constant 0 : index
    %c0_1 = arith.constant 0 : index
    %0 = vector.load %arg1[%c0, %c0_0, %c0_1] : memref<1x4x4xi32, #tpu.memory_space<vmem>>, vector<1x4x4xi32>
    %1 = vector.shape_cast %0 : vector<1x4x4xi32> to vector<4x4xi32>
    %c0_2 = arith.constant 0 : index
    %c0_3 = arith.constant 0 : index
    %c0_4 = arith.constant 0 : index
    %2 = vector.load %arg2[%c0_2, %c0_3, %c0_4] : memref<1x4x4xf32, #tpu.memory_space<vmem>>, vector<1x4x4xf32>
    %3 = vector.shape_cast %2 : vector<1x4x4xf32> to vector<4x4xf32>
    %4 = tpu.iota {dimensions = array<i32: 0>} : vector<64x4xi32>
    %cst = arith.constant 0.000000e+00 : f32
    %5 = vector.broadcast %cst : f32 to vector<64x4xf32>
    %6 = vector.extract_strided_slice %1 {offsets = [0, 0], sizes = [1, 4], strides = [1, 1]} : vector<4x4xi32> to vector<1x4xi32>
    %7 = vector.broadcast %6 : vector<1x4xi32> to vector<64x4xi32>
    %8 = arith.cmpi eq, %4, %7 : vector<64x4xi32>
    %9 = vector.extract_strided_slice %3 {offsets = [0, 0], sizes = [1, 4], strides = [1, 1]} : vector<4x4xf32> to vector<1x4xf32>
    %cst_5 = arith.constant 0.000000e+00 : f32
    %10 = vector.shape_cast %9 : vector<1x4xf32> to vector<1x4xf32>
    %11 = vector.broadcast %10 : vector<1x4xf32> to vector<64x4xf32>
    %12 = vector.broadcast %cst_5 : f32 to vector<64x4xf32>
    %13 = arith.select %8, %11, %12 : vector<64x4xi1>, vector<64x4xf32>
    %14 = arith.addf %5, %13 : vector<64x4xf32>
    %15 = vector.extract_strided_slice %1 {offsets = [1, 0], sizes = [1, 4], strides = [1, 1]} : vector<4x4xi32> to vector<1x4xi32>
    %16 = vector.broadcast %15 : vector<1x4xi32> to vector<64x4xi32>
    %17 = arith.cmpi eq, %4, %16 : vector<64x4xi32>
    %18 = vector.extract_strided_slice %3 {offsets = [1, 0], sizes = [1, 4], strides = [1, 1]} : vector<4x4xf32> to vector<1x4xf32>
    %cst_6 = arith.constant 0.000000e+00 : f32
    %19 = vector.shape_cast %18 : vector<1x4xf32> to vector<1x4xf32>
    %20 = vector.broadcast %19 : vector<1x4xf32> to vector<64x4xf32>
    %21 = vector.broadcast %cst_6 : f32 to vector<64x4xf32>
    %22 = arith.select %17, %20, %21 : vector<64x4xi1>, vector<64x4xf32>
    %23 = arith.addf %14, %22 : vector<64x4xf32>
    %24 = vector.extract_strided_slice %1 {offsets = [2, 0], sizes = [1, 4], strides = [1, 1]} : vector<4x4xi32> to vector<1x4xi32>
    %25 = vector.broadcast %24 : vector<1x4xi32> to vector<64x4xi32>
    %26 = arith.cmpi eq, %4, %25 : vector<64x4xi32>
    %27 = vector.extract_strided_slice %3 {offsets = [2, 0], sizes = [1, 4], strides = [1, 1]} : vector<4x4xf32> to vector<1x4xf32>
    %cst_7 = arith.constant 0.000000e+00 : f32
    %28 = vector.shape_cast %27 : vector<1x4xf32> to vector<1x4xf32>
    %29 = vector.broadcast %28 : vector<1x4xf32> to vector<64x4xf32>
    %30 = vector.broadcast %cst_7 : f32 to vector<64x4xf32>
    %31 = arith.select %26, %29, %30 : vector<64x4xi1>, vector<64x4xf32>
    %32 = arith.addf %23, %31 : vector<64x4xf32>
    %33 = vector.extract_strided_slice %1 {offsets = [3, 0], sizes = [1, 4], strides = [1, 1]} : vector<4x4xi32> to vector<1x4xi32>
    %34 = vector.broadcast %33 : vector<1x4xi32> to vector<64x4xi32>
    %35 = arith.cmpi eq, %4, %34 : vector<64x4xi32>
    %36 = vector.extract_strided_slice %3 {offsets = [3, 0], sizes = [1, 4], strides = [1, 1]} : vector<4x4xf32> to vector<1x4xf32>
    %cst_8 = arith.constant 0.000000e+00 : f32
    %37 = vector.shape_cast %36 : vector<1x4xf32> to vector<1x4xf32>
    %38 = vector.broadcast %37 : vector<1x4xf32> to vector<64x4xf32>
    %39 = vector.broadcast %cst_8 : f32 to vector<64x4xf32>
    %40 = arith.select %35, %38, %39 : vector<64x4xi1>, vector<64x4xf32>
    %41 = arith.addf %32, %40 : vector<64x4xf32>
    %c0_9 = arith.constant 0 : index
    %c0_10 = arith.constant 0 : index
    %c0_11 = arith.constant 0 : index
    %42 = vector.load %arg3[%c0_9, %c0_10, %c0_11] : memref<1x4x4xi32, #tpu.memory_space<vmem>>, vector<1x4x4xi32>
    %43 = vector.shape_cast %42 : vector<1x4x4xi32> to vector<4x4xi32>
    %c0_12 = arith.constant 0 : index
    %c0_13 = arith.constant 0 : index
    %c0_14 = arith.constant 0 : index
    %44 = vector.load %arg4[%c0_12, %c0_13, %c0_14] : memref<1x4x4xf32, #tpu.memory_space<vmem>>, vector<1x4x4xf32>
    %45 = vector.shape_cast %44 : vector<1x4x4xf32> to vector<4x4xf32>
    %46 = tpu.iota {dimensions = array<i32: 0>} : vector<256x4xi32>
    %cst_15 = arith.constant 0.000000e+00 : f32
    %47 = vector.broadcast %cst_15 : f32 to vector<256x4xf32>
    %48 = vector.extract_strided_slice %43 {offsets = [0, 0], sizes = [1, 4], strides = [1, 1]} : vector<4x4xi32> to vector<1x4xi32>
    %49 = vector.broadcast %48 : vector<1x4xi32> to vector<256x4xi32>
    %50 = arith.cmpi eq, %46, %49 : vector<256x4xi32>
    %51 = vector.extract_strided_slice %45 {offsets = [0, 0], sizes = [1, 4], strides = [1, 1]} : vector<4x4xf32> to vector<1x4xf32>
    %cst_16 = arith.constant 0.000000e+00 : f32
    %52 = vector.shape_cast %51 : vector<1x4xf32> to vector<1x4xf32>
    %53 = vector.broadcast %52 : vector<1x4xf32> to vector<256x4xf32>
    %54 = vector.broadcast %cst_16 : f32 to vector<256x4xf32>
    %55 = arith.select %50, %53, %54 : vector<256x4xi1>, vector<256x4xf32>
    %56 = arith.addf %47, %55 : vector<256x4xf32>
    %57 = vector.extract_strided_slice %43 {offsets = [1, 0], sizes = [1, 4], strides = [1, 1]} : vector<4x4xi32> to vector<1x4xi32>
    %58 = vector.broadcast %57 : vector<1x4xi32> to vector<256x4xi32>
    %59 = arith.cmpi eq, %46, %58 : vector<256x4xi32>
    %60 = vector.extract_strided_slice %45 {offsets = [1, 0], sizes = [1, 4], strides = [1, 1]} : vector<4x4xf32> to vector<1x4xf32>
    %cst_17 = arith.constant 0.000000e+00 : f32
    %61 = vector.shape_cast %60 : vector<1x4xf32> to vector<1x4xf32>
    %62 = vector.broadcast %61 : vector<1x4xf32> to vector<256x4xf32>
    %63 = vector.broadcast %cst_17 : f32 to vector<256x4xf32>
    %64 = arith.select %59, %62, %63 : vector<256x4xi1>, vector<256x4xf32>
    %65 = arith.addf %56, %64 : vector<256x4xf32>
    %66 = vector.extract_strided_slice %43 {offsets = [2, 0], sizes = [1, 4], strides = [1, 1]} : vector<4x4xi32> to vector<1x4xi32>
    %67 = vector.broadcast %66 : vector<1x4xi32> to vector<256x4xi32>
    %68 = arith.cmpi eq, %46, %67 : vector<256x4xi32>
    %69 = vector.extract_strided_slice %45 {offsets = [2, 0], sizes = [1, 4], strides = [1, 1]} : vector<4x4xf32> to vector<1x4xf32>
    %cst_18 = arith.constant 0.000000e+00 : f32
    %70 = vector.shape_cast %69 : vector<1x4xf32> to vector<1x4xf32>
    %71 = vector.broadcast %70 : vector<1x4xf32> to vector<256x4xf32>
    %72 = vector.broadcast %cst_18 : f32 to vector<256x4xf32>
    %73 = arith.select %68, %71, %72 : vector<256x4xi1>, vector<256x4xf32>
    %74 = arith.addf %65, %73 : vector<256x4xf32>
    %75 = vector.extract_strided_slice %43 {offsets = [3, 0], sizes = [1, 4], strides = [1, 1]} : vector<4x4xi32> to vector<1x4xi32>
    %76 = vector.broadcast %75 : vector<1x4xi32> to vector<256x4xi32>
    %77 = arith.cmpi eq, %46, %76 : vector<256x4xi32>
    %78 = vector.extract_strided_slice %45 {offsets = [3, 0], sizes = [1, 4], strides = [1, 1]} : vector<4x4xf32> to vector<1x4xf32>
    %cst_19 = arith.constant 0.000000e+00 : f32
    %79 = vector.shape_cast %78 : vector<1x4xf32> to vector<1x4xf32>
    %80 = vector.broadcast %79 : vector<1x4xf32> to vector<256x4xf32>
    %81 = vector.broadcast %cst_19 : f32 to vector<256x4xf32>
    %82 = arith.select %77, %80, %81 : vector<256x4xi1>, vector<256x4xf32>
    %83 = arith.addf %74, %82 : vector<256x4xf32>
    %c0_20 = arith.constant 0 : index
    %c0_21 = arith.constant 0 : index
    %c0_22 = arith.constant 0 : index
    %84 = vector.load %arg5[%c0_20, %c0_21, %c0_22] : memref<1x3x64xbf16, #tpu.memory_space<vmem>>, vector<1x3x64xbf16>
    %85 = vector.shape_cast %84 : vector<1x3x64xbf16> to vector<3x64xbf16>
    %86 = arith.extf %85 : vector<3x64xbf16> to vector<3x64xf32>
    %cst_23 = arith.constant dense<0.000000e+00> : vector<3x4xf32>
    %87 = tpu.matmul %86, %41, %cst_23 {dimension_numbers = #tpu.dot_dimension_numbers<[1], [0], [0], [1], [0, 0, 1, 1], [], []>} : vector<3x64xf32>, vector<64x4xf32>, vector<3x4xf32> -> vector<3x4xf32>
    %c0_24 = arith.constant 0 : index
    %c0_25 = arith.constant 0 : index
    %c0_26 = arith.constant 0 : index
    %88 = vector.load %arg6[%c0_24, %c0_25, %c0_26] : memref<1x8x256xbf16, #tpu.memory_space<vmem>>, vector<1x8x256xbf16>
    %89 = vector.shape_cast %88 : vector<1x8x256xbf16> to vector<8x256xbf16>
    %90 = arith.extf %89 : vector<8x256xbf16> to vector<8x256xf32>
    %cst_27 = arith.constant dense<0.000000e+00> : vector<8x4xf32>
    %91 = tpu.matmul %90, %83, %cst_27 {dimension_numbers = #tpu.dot_dimension_numbers<[1], [0], [0], [1], [0, 0, 1, 1], [], []>} : vector<8x256xf32>, vector<256x4xf32>, vector<8x4xf32> -> vector<8x4xf32>
    %c0_28 = arith.constant 0 : index
    %c0_29 = arith.constant 0 : index
    %92 = vector.load %arg7[%c0_28, %c0_29] : memref<3x3xf32, #tpu.memory_space<vmem>>, vector<3x3xf32>
    %cst_30 = arith.constant dense<0.000000e+00> : vector<3x4xf32>
    %93 = tpu.matmul %92, %87, %cst_30 {dimension_numbers = #tpu.dot_dimension_numbers<[1], [0], [0], [1], [0, 0, 1, 1], [], []>} : vector<3x3xf32>, vector<3x4xf32>, vector<3x4xf32> -> vector<3x4xf32>
    %c0_31 = arith.constant 0 : index
    %c0_32 = arith.constant 0 : index
    %94 = vector.load %arg8[%c0_31, %c0_32] : memref<3x8xf32, #tpu.memory_space<vmem>>, vector<3x8xf32>
    %cst_33 = arith.constant dense<0.000000e+00> : vector<3x4xf32>
    %95 = tpu.matmul %94, %91, %cst_33 {dimension_numbers = #tpu.dot_dimension_numbers<[1], [0], [0], [1], [0, 0, 1, 1], [], []>} : vector<3x8xf32>, vector<8x4xf32>, vector<3x4xf32> -> vector<3x4xf32>
    %96 = arith.addf %93, %95 : vector<3x4xf32>
    %c0_34 = arith.constant 0 : index
    %c0_35 = arith.constant 0 : index
    %97 = vector.load %arg9[%c0_34, %c0_35] : memref<3x1xf32, #tpu.memory_space<vmem>>, vector<3x1xf32>
    %98 = vector.broadcast %97 : vector<3x1xf32> to vector<3x4xf32>
    %99 = arith.addf %96, %98 : vector<3x4xf32>
    %c0_36 = arith.constant 0 : index
    %c0_37 = arith.constant 0 : index
    %c0_38 = arith.constant 0 : index
    %100 = vector.load %arg10[%c0_36, %c0_37, %c0_38] : memref<1x3x4xf32, #tpu.memory_space<vmem>>, vector<1x3x4xf32>
    %101 = vector.shape_cast %100 : vector<1x3x4xf32> to vector<3x4xf32>
    %102 = vector.shape_cast %99 : vector<3x4xf32> to vector<1x3x4xf32>
    tpu.vector_store %arg10[%c0_36, %c0_37, %c0_38], %102 {strides = array<i32>} : memref<1x3x4xf32, #tpu.memory_space<vmem>>, vector<1x3x4xf32>,
    return
  }
  func.func @transform_0(%arg0: i32) -> (i32, i32, i32) {
    %c0_i32 = arith.constant 0 : i32
    %c0_i32_0 = arith.constant 0 : i32
    %c0_i32_1 = arith.constant 0 : i32
    return %arg0, %c0_i32, %c0_i32_0 : i32, i32, i32
  }
  func.func @transform_1(%arg0: i32) -> (i32, i32, i32) {
    %c0_i32 = arith.constant 0 : i32
    %c0_i32_0 = arith.constant 0 : i32
    %c0_i32_1 = arith.constant 0 : i32
    return %arg0, %c0_i32, %c0_i32_0 : i32, i32, i32
  }
  func.func @transform_2(%arg0: i32) -> (i32, i32, i32) {
    %c0_i32 = arith.constant 0 : i32
    %c0_i32_0 = arith.constant 0 : i32
    %c0_i32_1 = arith.constant 0 : i32
    return %arg0, %c0_i32, %c0_i32_0 : i32, i32, i32
  }
  func.func @transform_3(%arg0: i32) -> (i32, i32, i32) {
    %c0_i32 = arith.constant 0 : i32
    %c0_i32_0 = arith.constant 0 : i32
    %c0_i32_1 = arith.constant 0 : i32
    return %arg0, %c0_i32, %c0_i32_0 : i32, i32, i32
  }
  func.func @transform_4(%arg0: i32) -> (i32, i32, i32) {
    %c0_i32 = arith.constant 0 : i32
    %c0_i32_0 = arith.constant 0 : i32
    %c0_i32_1 = arith.constant 0 : i32
    return %arg0, %c0_i32, %c0_i32_0 : i32, i32, i32
  }
  func.func @transform_5(%arg0: i32) -> (i32, i32, i32) {
    %c0_i32 = arith.constant 0 : i32
    %c0_i32_0 = arith.constant 0 : i32
    %c0_i32_1 = arith.constant 0 : i32
    return %arg0, %c0_i32, %c0_i32_0 : i32, i32, i32
  }
  func.func @transform_6(%arg0: i32) -> (i32, i32) {
    %c0_i32 = arith.constant 0 : i32
    %c0_i32_0 = arith.constant 0 : i32
    %c0_i32_1 = arith.constant 0 : i32
    return %c0_i32, %c0_i32_0 : i32, i32
  }
  func.func @transform_7(%arg0: i32) -> (i32, i32) {
    %c0_i32 = arith.constant 0 : i32
    %c0_i32_0 = arith.constant 0 : i32
    %c0_i32_1 = arith.constant 0 : i32
    return %c0_i32, %c0_i32_0 : i32, i32
  }
  func.func @transform_8(%arg0: i32) -> (i32, i32) {
    %c0_i32 = arith.constant 0 : i32
    %c0_i32_0 = arith.constant 0 : i32
    %c0_i32_1 = arith.constant 0 : i32
    return %c0_i32, %c0_i32_0 : i32, i32
  }
  func.func @transform_9(%arg0: i32) -> (i32, i32, i32) {
    %c0_i32 = arith.constant 0 : i32
    %c0_i32_0 = arith.constant 0 : i32
    %c0_i32_1 = arith.constant 0 : i32
    return %arg0, %c0_i32, %c0_i32_0 : i32, i32, i32
  }
}

</mosaic_0001>

<bundles_post_ra>
// kernel: pointrend_forward.3
= control target key start
LH: loop header
LB: loop body
LE: loop exit
PB: predicated region body
PF: predicated region fallthrough
CT: control target
= control target key end

     0   :  { %s690_s24 = smov 0   ;;  %s734_s0 = inlined_call_operand.vmem [shape: f32[2,4,256], index: 0, kind: input, shape index: {}]   ;;  %s735_s1 = inlined_call_operand.vmem [shape: f32[2,4,64], index: 1, kind: input, shape index: {}]   ;;  %s736_s2 = inlined_call_operand.vmem [shape: f32[8,4], index: 2, kind: input, shape index: {}]   ;;  %s737_s3 = inlined_call_operand.vmem [shape: f32[8,1], index: 3, kind: input, shape index: {}]   ;;  %s738_s4 = inlined_call_operand.vmem [shape: f32[3,4], index: 4, kind: input, shape index: {}]   ;;  %s739_s5 = inlined_call_operand.vmem [shape: f32[3,1], index: 5, kind: input, shape index: {}]   ;;  %s740_s6 = inlined_call_operand.vmem [shape: bf16[2,8,256], index: 6, kind: output, shape index: {0}]   ;;  %s741_s7 = inlined_call_operand.vmem [shape: bf16[2,3,64], index: 7, kind: output, shape index: {1}]  }
   0x1 LB: > { %s597_s25 = sadd.s32 4294967295, %s645_s24   ;;  %p601_p0 = scmp.ge.s32.totalorder %s645_s24, 1  ;;  %s645_s24 = sphi %s690_s24, %s18_s24  }
   0x2   : > { %p249_p1 = scmp.lt.s32.totalorder %s645_s24, 3 }
   0x4   : > { %p250_p2 = pnand %p601_p0, %p249_p1 }
   0x5   : > { %p289_p3 = scmp.lt.s32.totalorder (!%p250_p2), %s597_s25, 1  ;;  %v647_v0 = vmov (!%p250_p2), 0.0   ;;  %vm648_vm0 = vmmov (!%p250_p2), 0   ;;  %v309_v1 = vld [vmem:[%s737_s3] sm:$0xff] (!%p250_p2)  ;;  %v649_v2 = vmov (!%p250_p2), 0   ;;  %vm321_vm1 = vcmask (!%p250_p2), 1043456  }
   0x6   : > { %253 = sbr.rel (%p250_p2) target bundleno = 242 (0xf2), region = 44  ;;  %621 = vmatprep.subr.mxu1 (!%p250_p2), %v647_v0  ;;  %623 = vmatprep.mubr.msk.f32.mxu1 (!%p250_p2), %vm648_vm0, %v647_v0  ;;  %v410_v3 = vld [vmem:[%s739_s5] sm:$0x7] (!%p250_p2)  ;;  %vm317_vm2 = vcmask (!%p250_p2), 31744   ;;  %vm493_vm3 = vcmask (!%p250_p2), 517120  }
   0x7   : > { %390 = vmatprep.mubr.f32.mxu0 (!%p250_p2), %v647_v0  ;;  %637 = vset.pattern.permute.xlu0 (!%p250_p2), %v649_v2  ;;  %v408_v4 = vld [vmem:[%s738_s4] sm:$0x7] (!%p250_p2)  ;;  %vm494_vm4 = vsmask.f32 (!%p250_p2), 1280 }
   0x8   : > { %312 = vperm.xlu0 (!%p250_p2), %637, %v309_v1   ;;  %v307_v8 = vld [vmem:[%s736_s2] sm:$0xff] (!%p250_p2)  ;;  %vm495_vm5 = vmand (!%p250_p2), %vm493_vm3, %vm494_vm4 }
   0xc   : > { %413 = vperm.xlu0 (!%p250_p2), %637, %v410_v3  }
   0xd   : > { %s743_s25 = smov (!%p289_p3, %s597_s25), 1 }
   0xe   : > { %s604_s28 = sshll.u32 %s743_s25, 2  ;;  %s616_s29 = sshll.u32 %s743_s25, 3 }
   0xf   : > { %s297_s11 = scalar_lea.vmem %s735_s1, %s604_s28  ;;  %s293_s14 = scalar_lea.vmem %s734_s0, %s616_s29 }
  0x10   : > { %v409_v5 = vld [vmem:[%s297_s11] sm:$0xf]  ;;  %s607_s19 = sshll.u32 %s743_s25, 1  ;;  %s302_s27 = scalar_lea.vmem %s740_s6, %s616_s29 }
  0x11   : > { %v308_v6 = vld [vmem:[%s293_s14] sm:$0xff]  ;;  %622 = vmatpush3.msk.msra.mxu1 %vm321_vm1, %v409_v5  ;;  %s306_s22 = scalar_lea.vmem %s741_s7, %s607_s19 }
  0x12   : > { %v316_v7 = vcombine.high %v308_v6, %v308_v6  ;;  %624 = vmatmul.mubr.msk.f32.vlgmr.msra.gmra.mrb[0].mxu1 %vm317_vm2, %v408_v4  ;;  %v496_v14 = vld [vmem:[%s306_s22] sm:$0x3] }
  0x14   : > { %608 = vmatprep.subr.msk.mxu0 %vm321_vm1, %v316_v7 }
  0x15   : > { %609 = vmatpush1.msk.msra.mxu0 %vm321_vm1, %v308_v6 }
  0x16   : > { %610 = vmatmul.mubr.msk.f32.vlgmr.msra.gmra.mrb[0].mxu0 %vm317_vm2, %v307_v8 }
  0x87   : > { %v313_v9 = vpop.permute.xlu0 %312 }
  0x8b   : > { %v414_v10 = vpop.permute.xlu0 %413 }
  0xe5   : > { %v488_v11 = vpop.f32.mrb[0].mxu1 }
  0xe6   : > { %v489_v12 = vadd.f32 %v488_v11, %v414_v10  ;;  %v625_v13 = vpop.f32.mrb[1].mxu1 }
  0xe8   : > { %v492_v15 = vpack.c.bf16 %v489_v12, %v489_v12 }
  0xe9   : > { %v392_v16 = vpop.f32.mrb[0].mxu0 }
  0xea   : > { %v393_v17 = vadd.f32 %v392_v16, %v313_v9  ;;  %v394_v18 = vpop.f32.mrb[1].mxu0  ;;  %v497_v19 = vsel %vm495_vm5, %v492_v15, %v496_v14 }
  0xeb   : > { %v395_v20 = vadd.f32 %v394_v18, %v313_v9  ;;  %498 = vst [vmem:[%s306_s22] sm:$0x3] %v497_v19 }
  0xec   : > { %v397_v21 = vmax.f32 %v393_v17, 0.0 }
  0xed   : > { %v398_v22 = vmax.f32 %v395_v20, 0.0 }
  0xef   : > { %v618_v23 = vpack.c.bf16 %v398_v22, %v397_v21 }
  0xf1   : > { %407 = vst [vmem:[%s302_s27] sm:$0xff] %v618_v23 }
  0xf2 PF: > { %s18_s24 = sadd.s32 1, %s645_s24  }
  0xf3   : > { %p15_p4 = scmp.ge.s32.totalorder %s18_s24, 4  }
  0xf5   :  { %17 = sbr.rel (!%p15_p4) target bundleno = 1 (0x1), region = 89 }

// kernel: pointrend_forward.4
= control target key start
LH: loop header
LB: loop body
LE: loop exit
PB: predicated region body
PF: predicated region fallthrough
CT: control target
= control target key end

     0   :  { %s590_s12 = smov 0   ;;  %s737_s0 = inlined_call_operand.vmem [shape: s32[2,4,12], index: 0, kind: input, shape index: {}]   ;;  %s738_s1 = inlined_call_operand.vmem [shape: f32[2,4,12], index: 1, kind: input, shape index: {}]   ;;  %s739_s2 = inlined_call_operand.vmem [shape: bf16[2,3,64], index: 2, kind: input, shape index: {}]   ;;  %s740_s3 = inlined_call_operand.vmem [shape: f32[2,1,12], index: 3, kind: output, shape index: {}]  }
   0x1 LB: > { %s497_s13 = sadd.s32 4294967295, %s565_s12   ;;  %p501_p0 = scmp.ge.s32.totalorder %s565_s12, 1  ;;  %s565_s12 = sphi %s590_s12, %s13_s12  }
   0x2   : > { %p154_p1 = scmp.lt.s32.totalorder %s565_s12, 3 }
   0x4   : > { %p155_p2 = pnand %p501_p0, %p154_p1 }
   0x5   : > { %p183_p3 = scmp.lt.s32.totalorder (!%p155_p2), %s497_s13, 1  ;;  %v200_v0 = vlaneseq (!%p155_p2)  ;;  %v567_v1 = vmov (!%p155_p2), 0.0|0.0   ;;  %vm568_vm0 = vmmov (!%p155_p2), 0   ;;  %v569_v2 = vmov (!%p155_p2), 0.0  }
   0x6   : > { %158 = sbr.rel (%p155_p2) target bundleno = 273 (0x111), region = 32  ;;  %536 = vmatprep.subr.bf16.mxu0 (!%p155_p2), %v567_v1  ;;  %533 = vmatprep.mubr.msk.f32.mxu0 (!%p155_p2), %vm568_vm0, %v569_v2 }
   0x7   : > { %v601_v3 = vshrl.u32 (!%p155_p2), %v200_v0, 7 }
   0x9   : > { %v202_v4 = vadd.s32 (!%p155_p2), 8, %v601_v3  ;;  %v211_v5 = vsub.s32 (!%p155_p2), 0, %v601_v3  ;;  %v243_v6 = vsub.s32 (!%p155_p2), 1, %v601_v3  ;;  %v275_v7 = vsub.s32 (!%p155_p2), 2, %v601_v3 }
   0xa   : > { %v307_v8 = vsub.s32 (!%p155_p2), 3, %v601_v3  ;;  %v203_v9 = vadd.s32 (!%p155_p2), 16, %v601_v3  ;;  %v204_v10 = vadd.s32 (!%p155_p2), 24, %v601_v3  ;;  %v618_v11 = vadd.s32 (!%p155_p2), 32, %v601_v3 }
   0xb   : > { %v621_v14 = vadd.s32 (!%p155_p2), 40, %v601_v3  ;;  %v624_v15 = vadd.s32 (!%p155_p2), 48, %v601_v3  ;;  %v208_v63 = vadd.s32 (!%p155_p2), 56, %v601_v3 }
   0xd   : > { %s742_s13 = smov (!%p183_p3, %s497_s13), 1 }
   0xe   : > { %s502_s14 = sshll.u32 %s742_s13, 2  ;;  %s504_s21 = sshll.u32 %s742_s13, 1 }
   0xf   : > { %s186_s17 = scalar_lea.vmem %s737_s0, %s502_s14  ;;  %s190_s20 = scalar_lea.vmem %s738_s1, %s502_s14 }
  0x10   : > { %v198_v12 = vld [vmem:[%s186_s17] sm:$0xf]  ;;  %s194_s24 = scalar_lea.vmem %s739_s2, %s504_s21  ;;  %s197_s27 = scalar_lea.vmem %s740_s3, %s742_s13 }
  0x11   : > { %v199_v13 = vld [vmem:[%s190_s20] sm:$0xf]  ;;  %v626_v16 = vrot.slane %v198_v12, %v211_v5  ;;  %v630_v18 = vrot.slane %v198_v12, %v243_v6  ;;  %v634_v20 = vrot.slane %v198_v12, %v275_v7  ;;  %v638_v22 = vrot.slane %v198_v12, %v307_v8 }
  0x12   : > { %v628_v17 = vrot.slane %v199_v13, %v211_v5  ;;  %v632_v19 = vrot.slane %v199_v13, %v243_v6  ;;  %v636_v21 = vrot.slane %v199_v13, %v275_v7  ;;  %v640_v23 = vrot.slane %v199_v13, %v307_v8 }
  0x13   : > { %vm213_vm1 = vcmp.eq.s32.totalorder %v601_v3, %v626_v16  ;;  %vm214_vm2 = vcmp.eq.s32.totalorder %v202_v4, %v626_v16  ;;  %vm245_vm3 = vcmp.eq.s32.totalorder %v601_v3, %v630_v18  ;;  %vm246_vm4 = vcmp.eq.s32.totalorder %v202_v4, %v630_v18 }
  0x14   : > { %v225_v24 = vsel %vm213_vm1, %v628_v17, 0.0  ;;  %v226_v25 = vsel %vm214_vm2, %v628_v17, 0.0  ;;  %v257_v26 = vsel %vm245_vm3, %v632_v19, 0.0  ;;  %v258_v27 = vsel %vm246_vm4, %v632_v19, 0.0 }
  0x15   : > { %v265_v28 = vadd.f32 %v257_v26, %v225_v24  ;;  %v266_v29 = vadd.f32 %v258_v27, %v226_v25  ;;  %vm277_vm5 = vcmp.eq.s32.totalorder %v601_v3, %v634_v20  ;;  %vm278_vm6 = vcmp.eq.s32.totalorder %v202_v4, %v634_v20  ;;  %v337_v24 = vld [vmem:[%s194_s24] sm:$0x3] }
  0x16   : > { %v289_v30 = vsel %vm277_vm5, %v636_v21, 0.0  ;;  %v290_v31 = vsel %vm278_vm6, %v636_v21, 0.0  ;;  %vm309_vm7 = vcmp.eq.s32.totalorder %v601_v3, %v638_v22  ;;  %vm310_vm8 = vcmp.eq.s32.totalorder %v202_v4, %v638_v22 }
  0x17   : > { %v297_v32 = vadd.f32 %v289_v30, %v265_v28  ;;  %v298_v33 = vadd.f32 %v290_v31, %v266_v29  ;;  %v321_v34 = vsel %vm309_vm7, %v640_v23, 0.0  ;;  %v322_v35 = vsel %vm310_vm8, %v640_v23, 0.0 }
  0x18   : > { %vm215_vm9 = vcmp.eq.s32.totalorder %v203_v9, %v626_v16  ;;  %vm216_vm10 = vcmp.eq.s32.totalorder %v204_v10, %v626_v16  ;;  %vm247_vm11 = vcmp.eq.s32.totalorder %v203_v9, %v630_v18  ;;  %vm248_vm12 = vcmp.eq.s32.totalorder %v204_v10, %v630_v18 }
  0x19   : > { %v329_v36 = vadd.f32 %v321_v34, %v297_v32  ;;  %v330_v37 = vadd.f32 %v322_v35, %v298_v33  ;;  %v227_v38 = vsel %vm215_vm9, %v628_v17, 0.0  ;;  %v228_v39 = vsel %vm216_vm10, %v628_v17, 0.0 }
  0x1a   : > { %v259_v40 = vsel %vm247_vm11, %v632_v19, 0.0  ;;  %v260_v41 = vsel %vm248_vm12, %v632_v19, 0.0  ;;  %vm279_vm13 = vcmp.eq.s32.totalorder %v203_v9, %v634_v20  ;;  %vm280_vm14 = vcmp.eq.s32.totalorder %v204_v10, %v634_v20 }
  0x1b   : > { %v537_v42 = vpack.c.bf16 %v330_v37, %v329_v36  ;;  %v267_v43 = vadd.f32 %v259_v40, %v227_v38  ;;  %v268_v44 = vadd.f32 %v260_v41, %v228_v39  ;;  %v291_v45 = vsel %vm279_vm13, %v636_v21, 0.0 }
  0x1c   : > { %v292_v46 = vsel %vm280_vm14, %v636_v21, 0.0  ;;  %vm311_vm15 = vcmp.eq.s32.totalorder %v203_v9, %v638_v22  ;;  %vm312_vm0 = vcmp.eq.s32.totalorder %v204_v10, %v638_v22  ;;  %vm217_vm1 = vcmp.eq.s32.totalorder %v618_v11, %v626_v16 }
  0x1d   : > { %538 = vmatpush3.bf16.msra.mxu0 %v537_v42  ;;  %v299_v47 = vadd.f32 %v291_v45, %v267_v43  ;;  %v300_v48 = vadd.f32 %v292_v46, %v268_v44  ;;  %v323_v49 = vsel %vm311_vm15, %v640_v23, 0.0  ;;  %v324_v50 = vsel %vm312_vm0, %v640_v23, 0.0 }
  0x1e   : > { %539 = vmatprep.subr.bf16.mxu0 %v567_v1  ;;  %vm218_vm2 = vcmp.eq.s32.totalorder %v621_v14, %v626_v16  ;;  %v229_v51 = vsel %vm217_vm1, %v628_v17, 0.0  ;;  %vm249_vm3 = vcmp.eq.s32.totalorder %v618_v11, %v630_v18  ;;  %vm250_vm4 = vcmp.eq.s32.totalorder %v621_v14, %v630_v18 }
  0x1f   : > { %v331_v52 = vadd.f32 %v323_v49, %v299_v47  ;;  %v332_v53 = vadd.f32 %v324_v50, %v300_v48  ;;  %v230_v54 = vsel %vm218_vm2, %v628_v17, 0.0  ;;  %v261_v55 = vsel %vm249_vm3, %v632_v19, 0.0 }
  0x20   : > { %v262_v56 = vsel %vm250_vm4, %v632_v19, 0.0  ;;  %v269_v57 = vadd.f32 %v261_v55, %v229_v51  ;;  %vm281_vm5 = vcmp.eq.s32.totalorder %v618_v11, %v634_v20  ;;  %vm282_vm6 = vcmp.eq.s32.totalorder %v621_v14, %v634_v20 }
  0x21   : > { %v540_v58 = vpack.c.bf16 %v332_v53, %v331_v52  ;;  %v270_v59 = vadd.f32 %v262_v56, %v230_v54  ;;  %v293_v60 = vsel %vm281_vm5, %v636_v21, 0.0  ;;  %v294_v61 = vsel %vm282_vm6, %v636_v21, 0.0 }
  0x22   : > { %v301_v62 = vadd.f32 %v293_v60, %v269_v57  ;;  %vm313_vm7 = vcmp.eq.s32.totalorder %v618_v11, %v638_v22  ;;  %vm314_vm8 = vcmp.eq.s32.totalorder %v621_v14, %v638_v22  ;;  %vm219_vm9 = vcmp.eq.s32.totalorder %v624_v15, %v626_v16 }
  0x23   : > { %541 = vmatpush3.bf16.msra.mxu0 %v540_v58  ;;  %v302_v0 = vadd.f32 %v294_v61, %v270_v59  ;;  %v325_v2 = vsel %vm313_vm7, %v640_v23, 0.0  ;;  %v326_v4 = vsel %vm314_vm8, %v640_v23, 0.0  ;;  %vm220_vm10 = vcmp.eq.s32.totalorder %v208_v63, %v626_v16 }
  0x24   : > { %542 = vmatprep.subr.bf16.mxu0 %v567_v1  ;;  %v333_v5 = vadd.f32 %v325_v2, %v301_v62  ;;  %v231_v6 = vsel %vm219_vm9, %v628_v17, 0.0  ;;  %vm251_vm11 = vcmp.eq.s32.totalorder %v624_v15, %v630_v18  ;;  %v232_v7 = vsel %vm220_vm10, %v628_v17, 0.0 }
  0x25   : > { %v334_v3 = vadd.f32 %v326_v4, %v302_v0  ;;  %vm252_vm12 = vcmp.eq.s32.totalorder %v208_v63, %v630_v18  ;;  %v263_v8 = vsel %vm251_vm11, %v632_v19, 0.0  ;;  %vm283_vm13 = vcmp.eq.s32.totalorder %v624_v15, %v634_v20 }
  0x26   : > { %v264_v9 = vsel %vm252_vm12, %v632_v19, 0.0  ;;  %v271_v10 = vadd.f32 %v263_v8, %v231_v6  ;;  %vm284_vm14 = vcmp.eq.s32.totalorder %v208_v63, %v634_v20  ;;  %v295_v13 = vsel %vm283_vm13, %v636_v21, 0.0 }
  0x27   : > { %v543_v11 = vpack.c.bf16 %v334_v3, %v333_v5  ;;  %v272_v12 = vadd.f32 %v264_v9, %v232_v7  ;;  %v296_v14 = vsel %vm284_vm14, %v636_v21, 0.0  ;;  %vm315_vm15 = vcmp.eq.s32.totalorder %v624_v15, %v638_v22 }
  0x28   : > { %v303_v16 = vadd.f32 %v295_v13, %v271_v10  ;;  %vm316_vm0 = vcmp.eq.s32.totalorder %v208_v63, %v638_v22  ;;  %v327_v18 = vsel %vm315_vm15, %v640_v23, 0.0  ;;  %v338_v15 = vunpack.c.l.bf16 %v337_v24 }
  0x29   : > { %544 = vmatpush3.bf16.msra.mxu0 %v543_v11  ;;  %v304_v17 = vadd.f32 %v296_v14, %v272_v12  ;;  %v328_v19 = vsel %vm316_vm0, %v640_v23, 0.0  ;;  %vm339_vm1 = vcmask 523264   ;;  %vm424_vm2 = vcmask 90112  }
  0x2a   : > { %545 = vmatprep.subr.bf16.mxu0 %v567_v1  ;;  %v335_v20 = vadd.f32 %v327_v18, %v303_v16 }
  0x2b   : > { %v336_v21 = vadd.f32 %v328_v19, %v304_v17 }
  0x2d   : > { %v546_v25 = vpack.c.bf16 %v336_v21, %v335_v20 }
  0x2f   : > { %547 = vmatpush3.bf16.msra.mxu0 %v546_v25 }
  0x32   : > { %534 = vmatmul.mubr.msk.f32.vlgmr.msra.gmra.mrb[0].mxu0 %vm339_vm1, %v338_v15 }
 0x105   : > { %v409_v22 = vpop.f32.mrb[0].mxu0 }
 0x106   : > { %v414_v26 = vrot.slane %v409_v22, 1  ;;  %v535_v27 = vpop.f32.mrb[1].mxu0  ;;  %v418_v29 = vrot.slane %v409_v22, 2 }
 0x108   : > { %v417_v28 = vmax.f32 %v409_v22, %v414_v26  ;;  %v416_v30 = vmin.f32 %v409_v22, %v414_v26 }
 0x10a   : > { %v420_v31 = vmin.f32 %v417_v28, %v418_v29  ;;  %v422_v23 = vmax.f32 %v417_v28, %v418_v29 }
 0x10c   : > { %v421_v32 = vmax.f32 %v416_v30, %v420_v31 }
 0x10e   : > { %v423_v1 = vsub.f32 %v421_v32, %v422_v23 }
 0x110   : > { %425 = vst.msk [vmem:[%s197_s27] sm:$0x1] %vm424_vm2, %v423_v1 }
 0x111 PF: > { %s13_s12 = sadd.s32 1, %s565_s12  }
 0x112   : > { %p10_p4 = scmp.ge.s32.totalorder %s13_s12, 4  }
 0x114   :  { %12 = sbr.rel (!%p10_p4) target bundleno = 1 (0x1), region = 68 }

// kernel: pointrend_forward.5
= control target key start
LH: loop header
LB: loop body
LE: loop exit
PB: predicated region body
PF: predicated region fallthrough
CT: control target
= control target key end

     0   :  { %s1638_s30 = smov 0   ;;  %s2204_s0 = inlined_call_operand.vmem [shape: s32[2,4,4], index: 0, kind: input, shape index: {}]   ;;  %s2205_s1 = inlined_call_operand.vmem [shape: f32[2,4,4], index: 1, kind: input, shape index: {}]   ;;  %s2206_s2 = inlined_call_operand.vmem [shape: s32[2,4,4], index: 2, kind: input, shape index: {}]   ;;  %s2207_s3 = inlined_call_operand.vmem [shape: f32[2,4,4], index: 3, kind: input, shape index: {}]   ;;  %s2208_s4 = inlined_call_operand.vmem [shape: bf16[2,3,64], index: 4, kind: input, shape index: {}]   ;;  %s2209_s5 = inlined_call_operand.vmem [shape: bf16[2,8,256], index: 5, kind: input, shape index: {}]   ;;  %s2210_s6 = inlined_call_operand.vmem [shape: f32[3,3], index: 6, kind: input, shape index: {}]   ;;  %s2211_s7 = inlined_call_operand.vmem [shape: f32[3,8], index: 7, kind: input, shape index: {}]   ;;  %s2212_s8 = inlined_call_operand.vmem [shape: f32[3,1], index: 8, kind: input, shape index: {}]   ;;  %s2213_s9 = inlined_call_operand.vmem [shape: f32[2,3,4], index: 9, kind: output, shape index: {}]  }
   0x1 LB: > { %s1422_s10 = sadd.s32 4294967295, %s1582_s30   ;;  %p1426_p0 = scmp.ge.s32.totalorder %s1582_s30, 1  ;;  %s1582_s30 = sphi %s1638_s30, %s19_s30  }
   0x2   : > { %p332_p1 = scmp.lt.s32.totalorder %s1582_s30, 3 }
   0x4   : > { %p333_p2 = pnand %p1426_p0, %p332_p1 }
   0x5   : > { %p387_p3 = scmp.lt.s32.totalorder (!%p333_p2), %s1422_s10, 1  ;;  %v418_v0 = vlaneseq (!%p333_p2)  ;;  %v1584_v1 = vmov (!%p333_p2), 0.0|0.0  }
   0x6   : > { %336 = sbr.rel (%p333_p2) target bundleno = 580 (0x244), region = 56  ;;  %1519 = vmatprep.subr.bf16.mxu0 (!%p333_p2), %v1584_v1 }
   0x7   : > { %v1649_v2 = vshrl.u32 (!%p333_p2), %v418_v0, 7 }
   0x9   : > { %v1655_v3 = vsub.s32 (!%p333_p2), 0, %v1649_v2  ;;  %v1658_v4 = vsub.s32 (!%p333_p2), 1, %v1649_v2  ;;  %v1661_v5 = vsub.s32 (!%p333_p2), 2, %v1649_v2  ;;  %v1664_v6 = vsub.s32 (!%p333_p2), 3, %v1649_v2 }
   0xa   : > { %v565_v7 = vadd.s32 (!%p333_p2), 128, %v1649_v2  ;;  %v566_v8 = vadd.s32 (!%p333_p2), 136, %v1649_v2  ;;  %v1677_v9 = vadd.s32 (!%p333_p2), 8, %v1649_v2  ;;  %v1680_v10 = vadd.s32 (!%p333_p2), 144, %v1649_v2 }
   0xb   : > { %v1683_v13 = vadd.s32 (!%p333_p2), 152, %v1649_v2  ;;  %v1686_v14 = vadd.s32 (!%p333_p2), 16, %v1649_v2  ;;  %v1775_v62 = vadd.s32 (!%p333_p2), 24, %v1649_v2 }
   0xd   : > { %s2215_s10 = smov (!%p387_p3, %s1422_s10), 1 }
   0xe   : > { %s1652_s11 = sshll.u32 %s2215_s10, 2  ;;  %s1441_s24 = sshll.u32 %s2215_s10, 3 }
   0xf   : > { %s398_s14 = scalar_lea.vmem %s2206_s2, %s1652_s11  ;;  %s402_s17 = scalar_lea.vmem %s2207_s3, %s1652_s11 }
  0x10   : > { %v555_v11 = vld [vmem:[%s398_s14] sm:$0xf]  ;;  %s390_s20 = scalar_lea.vmem %s2204_s0, %s1652_s11  ;;  %s394_s23 = scalar_lea.vmem %s2205_s1, %s1652_s11 }
  0x11   : > { %v556_v12 = vld [vmem:[%s402_s17] sm:$0xf]  ;;  %v1689_v15 = vrot.slane %v555_v11, %v1655_v3  ;;  %v1695_v17 = vrot.slane %v555_v11, %v1658_v4  ;;  %v1701_v19 = vrot.slane %v555_v11, %v1661_v5  ;;  %v1707_v21 = vrot.slane %v555_v11, %v1664_v6  ;;  %s411_s27 = scalar_lea.vmem %s2209_s5, %s1441_s24  ;;  %s1431_s28 = sshll.u32 %s2215_s10, 1 }
  0x12   : > { %v1692_v16 = vrot.slane %v556_v12, %v1655_v3  ;;  %v1698_v18 = vrot.slane %v556_v12, %v1658_v4  ;;  %v1704_v20 = vrot.slane %v556_v12, %v1661_v5  ;;  %v1710_v22 = vrot.slane %v556_v12, %v1664_v6  ;;  %s406_s12 = scalar_lea.vmem %s2208_s4, %s1431_s28  ;;  %s415_s21 = scalar_lea.vmem %s2213_s9, %s1652_s11 }
  0x13   : > { %vm601_vm0 = vcmp.eq.s32.totalorder %v565_v7, %v1689_v15  ;;  %vm602_vm1 = vcmp.eq.s32.totalorder %v566_v8, %v1689_v15  ;;  %vm705_vm2 = vcmp.eq.s32.totalorder %v565_v7, %v1695_v17  ;;  %vm706_vm3 = vcmp.eq.s32.totalorder %v566_v8, %v1695_v17 }
  0x14   : > { %v637_v23 = vsel %vm601_vm0, %v1692_v16, 0.0  ;;  %v638_v24 = vsel %vm602_vm1, %v1692_v16, 0.0  ;;  %v741_v25 = vsel %vm705_vm2, %v1698_v18, 0.0  ;;  %v742_v26 = vsel %vm706_vm3, %v1698_v18, 0.0 }
  0x15   : > { %v773_v27 = vadd.f32 %v741_v25, %v637_v23  ;;  %v774_v28 = vadd.f32 %v742_v26, %v638_v24  ;;  %vm809_vm4 = vcmp.eq.s32.totalorder %v565_v7, %v1701_v19  ;;  %vm810_vm5 = vcmp.eq.s32.totalorder %v566_v8, %v1701_v19 }
  0x16   : > { %v845_v29 = vsel %vm809_vm4, %v1704_v20, 0.0  ;;  %v846_v30 = vsel %vm810_vm5, %v1704_v20, 0.0  ;;  %vm913_vm6 = vcmp.eq.s32.totalorder %v565_v7, %v1707_v21  ;;  %vm914_vm7 = vcmp.eq.s32.totalorder %v566_v8, %v1707_v21 }
  0x17   : > { %v877_v31 = vadd.f32 %v845_v29, %v773_v27  ;;  %v878_v32 = vadd.f32 %v846_v30, %v774_v28  ;;  %v949_v33 = vsel %vm913_vm6, %v1710_v22, 0.0  ;;  %v950_v34 = vsel %vm914_vm7, %v1710_v22, 0.0 }
  0x18   : > { %vm585_vm8 = vcmp.eq.s32.totalorder %v1649_v2, %v1689_v15  ;;  %vm586_vm9 = vcmp.eq.s32.totalorder %v1677_v9, %v1689_v15  ;;  %vm689_vm10 = vcmp.eq.s32.totalorder %v1649_v2, %v1695_v17  ;;  %vm690_vm11 = vcmp.eq.s32.totalorder %v1677_v9, %v1695_v17 }
  0x19   : > { %v981_v35 = vadd.f32 %v949_v33, %v877_v31  ;;  %v982_v36 = vadd.f32 %v950_v34, %v878_v32  ;;  %v621_v37 = vsel %vm585_vm8, %v1692_v16, 0.0  ;;  %v622_v38 = vsel %vm586_vm9, %v1692_v16, 0.0 }
  0x1a   : > { %v725_v39 = vsel %vm689_vm10, %v1698_v18, 0.0  ;;  %v726_v40 = vsel %vm690_vm11, %v1698_v18, 0.0  ;;  %vm793_vm12 = vcmp.eq.s32.totalorder %v1649_v2, %v1701_v19  ;;  %vm794_vm13 = vcmp.eq.s32.totalorder %v1677_v9, %v1701_v19 }
  0x1b   : > { %v1531_v41 = vpack.c.bf16 %v982_v36, %v981_v35  ;;  %v757_v42 = vadd.f32 %v725_v39, %v621_v37  ;;  %v758_v43 = vadd.f32 %v726_v40, %v622_v38  ;;  %v829_v44 = vsel %vm793_vm12, %v1704_v20, 0.0 }
  0x1c   : > { %v830_v45 = vsel %vm794_vm13, %v1704_v20, 0.0  ;;  %vm897_vm14 = vcmp.eq.s32.totalorder %v1649_v2, %v1707_v21  ;;  %vm898_vm15 = vcmp.eq.s32.totalorder %v1677_v9, %v1707_v21  ;;  %vm603_vm0 = vcmp.eq.s32.totalorder %v1680_v10, %v1689_v15 }
  0x1d   : > { %1532 = vmatprep.subr.bf16.mxu1 %v1531_v41  ;;  %v861_v46 = vadd.f32 %v829_v44, %v757_v42  ;;  %v862_v47 = vadd.f32 %v830_v45, %v758_v43  ;;  %v933_v48 = vsel %vm897_vm14, %v1710_v22, 0.0  ;;  %v934_v49 = vsel %vm898_vm15, %v1710_v22, 0.0 }
  0x1e   : > { %vm604_vm1 = vcmp.eq.s32.totalorder %v1683_v13, %v1689_v15  ;;  %v639_v50 = vsel %vm603_vm0, %v1692_v16, 0.0  ;;  %vm707_vm2 = vcmp.eq.s32.totalorder %v1680_v10, %v1695_v17  ;;  %vm708_vm3 = vcmp.eq.s32.totalorder %v1683_v13, %v1695_v17 }
  0x1f   : > { %v965_v51 = vadd.f32 %v933_v48, %v861_v46  ;;  %v966_v52 = vadd.f32 %v934_v49, %v862_v47  ;;  %v640_v53 = vsel %vm604_vm1, %v1692_v16, 0.0  ;;  %v743_v54 = vsel %vm707_vm2, %v1698_v18, 0.0 }
  0x20   : > { %v744_v55 = vsel %vm708_vm3, %v1698_v18, 0.0  ;;  %v775_v56 = vadd.f32 %v743_v54, %v639_v50  ;;  %vm811_vm4 = vcmp.eq.s32.totalorder %v1680_v10, %v1701_v19  ;;  %vm812_vm5 = vcmp.eq.s32.totalorder %v1683_v13, %v1701_v19 }
  0x21   : > { %v1533_v57 = vpack.c.bf16 %v966_v52, %v965_v51  ;;  %v776_v58 = vadd.f32 %v744_v55, %v640_v53  ;;  %v847_v59 = vsel %vm811_vm4, %v1704_v20, 0.0  ;;  %v848_v60 = vsel %vm812_vm5, %v1704_v20, 0.0 }
  0x22   : > { %v879_v61 = vadd.f32 %v847_v59, %v775_v56  ;;  %vm915_vm6 = vcmp.eq.s32.totalorder %v1680_v10, %v1707_v21  ;;  %vm916_vm7 = vcmp.eq.s32.totalorder %v1683_v13, %v1707_v21  ;;  %vm587_vm8 = vcmp.eq.s32.totalorder %v1686_v14, %v1689_v15 }
  0x23   : > { %1534 = vmatpush3.bf16.msra.mxu1 %v1533_v57  ;;  %v880_v63 = vadd.f32 %v848_v60, %v776_v58  ;;  %v951_v0 = vsel %vm915_vm6, %v1710_v22, 0.0  ;;  %v952_v7 = vsel %vm916_vm7, %v1710_v22, 0.0  ;;  %vm588_vm9 = vcmp.eq.s32.totalorder %v1775_v62, %v1689_v15 }
  0x24   : > { %v983_v8 = vadd.f32 %v951_v0, %v879_v61  ;;  %v623_v10 = vsel %vm587_vm8, %v1692_v16, 0.0  ;;  %vm691_vm10 = vcmp.eq.s32.totalorder %v1686_v14, %v1695_v17  ;;  %v624_v12 = vsel %vm588_vm9, %v1692_v16, 0.0 }
  0x25   : > { %v984_v11 = vadd.f32 %v952_v7, %v880_v63  ;;  %vm692_vm11 = vcmp.eq.s32.totalorder %v1775_v62, %v1695_v17  ;;  %v727_v13 = vsel %vm691_vm10, %v1698_v18, 0.0  ;;  %vm795_vm12 = vcmp.eq.s32.totalorder %v1686_v14, %v1701_v19 }
  0x26   : > { %v728_v23 = vsel %vm692_vm11, %v1698_v18, 0.0  ;;  %v759_v24 = vadd.f32 %v727_v13, %v623_v10  ;;  %vm796_vm13 = vcmp.eq.s32.totalorder %v1775_v62, %v1701_v19  ;;  %v831_v27 = vsel %vm795_vm12, %v1704_v20, 0.0 }
  0x27   : > { %v1535_v25 = vpack.c.bf16 %v984_v11, %v983_v8  ;;  %v760_v26 = vadd.f32 %v728_v23, %v624_v12  ;;  %v832_v28 = vsel %vm796_vm13, %v1704_v20, 0.0  ;;  %vm899_vm14 = vcmp.eq.s32.totalorder %v1686_v14, %v1707_v21 }
  0x28   : > { %v863_v29 = vadd.f32 %v831_v27, %v759_v24  ;;  %vm900_vm15 = vcmp.eq.s32.totalorder %v1775_v62, %v1707_v21  ;;  %v569_v30 = vadd.s32 160, %v1649_v2  ;;  %v935_v32 = vsel %vm899_vm14, %v1710_v22, 0.0 }
  0x29   : > { %1536 = vmatprep.subr.bf16.mxu1 %v1535_v25  ;;  %v864_v31 = vadd.f32 %v832_v28, %v760_v26  ;;  %v936_v33 = vsel %vm900_vm15, %v1710_v22, 0.0  ;;  %v570_v34 = vadd.s32 168, %v1649_v2  ;;  %v1820_v46 = vadd.s32 32, %v1649_v2 }
  0x2a   : > { %v967_v35 = vadd.f32 %v935_v32, %v863_v29  ;;  %vm605_vm0 = vcmp.eq.s32.totalorder %v569_v30, %v1689_v15  ;;  %vm709_vm1 = vcmp.eq.s32.totalorder %v569_v30, %v1695_v17  ;;  %vm813_vm2 = vcmp.eq.s32.totalorder %v569_v30, %v1701_v19 }
  0x2b   : > { %v968_v36 = vadd.f32 %v936_v33, %v864_v31  ;;  %vm606_vm3 = vcmp.eq.s32.totalorder %v570_v34, %v1689_v15  ;;  %v641_v37 = vsel %vm605_vm0, %v1692_v16, 0.0  ;;  %vm710_vm4 = vcmp.eq.s32.totalorder %v570_v34, %v1695_v17 }
  0x2c   : > { %v642_v38 = vsel %vm606_vm3, %v1692_v16, 0.0  ;;  %v745_v39 = vsel %vm709_vm1, %v1698_v18, 0.0  ;;  %v746_v40 = vsel %vm710_vm4, %v1698_v18, 0.0  ;;  %vm814_vm5 = vcmp.eq.s32.totalorder %v570_v34, %v1701_v19 }
  0x2d   : > { %v1537_v41 = vpack.c.bf16 %v968_v36, %v967_v35  ;;  %v777_v42 = vadd.f32 %v745_v39, %v641_v37  ;;  %v778_v43 = vadd.f32 %v746_v40, %v642_v38  ;;  %v849_v44 = vsel %vm813_vm2, %v1704_v20, 0.0 }
  0x2e   : > { %v850_v45 = vsel %vm814_vm5, %v1704_v20, 0.0  ;;  %vm917_vm6 = vcmp.eq.s32.totalorder %v569_v30, %v1707_v21  ;;  %vm918_vm7 = vcmp.eq.s32.totalorder %v570_v34, %v1707_v21  ;;  %v1825_v51 = vadd.s32 40, %v1649_v2 }
  0x2f   : > { %1538 = vmatpush3.bf16.msra.mxu1 %v1537_v41  ;;  %v881_v47 = vadd.f32 %v849_v44, %v777_v42  ;;  %v882_v48 = vadd.f32 %v850_v45, %v778_v43  ;;  %v953_v49 = vsel %vm917_vm6, %v1710_v22, 0.0  ;;  %v954_v50 = vsel %vm918_vm7, %v1710_v22, 0.0 }
  0x30   : > { %vm589_vm8 = vcmp.eq.s32.totalorder %v1820_v46, %v1689_v15  ;;  %vm693_vm9 = vcmp.eq.s32.totalorder %v1820_v46, %v1695_v17  ;;  %vm797_vm10 = vcmp.eq.s32.totalorder %v1820_v46, %v1701_v19  ;;  %vm590_vm11 = vcmp.eq.s32.totalorder %v1825_v51, %v1689_v15 }
  0x31   : > { %v985_v52 = vadd.f32 %v953_v49, %v881_v47  ;;  %v986_v53 = vadd.f32 %v954_v50, %v882_v48  ;;  %v625_v54 = vsel %vm589_vm8, %v1692_v16, 0.0  ;;  %v729_v55 = vsel %vm693_vm9, %v1698_v18, 0.0 }
  0x32   : > { %vm694_vm12 = vcmp.eq.s32.totalorder %v1825_v51, %v1695_v17  ;;  %v761_v56 = vadd.f32 %v729_v55, %v625_v54  ;;  %vm798_vm13 = vcmp.eq.s32.totalorder %v1825_v51, %v1701_v19  ;;  %v626_v58 = vsel %vm590_vm11, %v1692_v16, 0.0 }
  0x33   : > { %v1539_v57 = vpack.c.bf16 %v986_v53, %v985_v52  ;;  %v730_v59 = vsel %vm694_vm12, %v1698_v18, 0.0  ;;  %v833_v60 = vsel %vm797_vm10, %v1704_v20, 0.0  ;;  %v834_v63 = vsel %vm798_vm13, %v1704_v20, 0.0 }
  0x34   : > { %v762_v61 = vadd.f32 %v730_v59, %v626_v58  ;;  %v865_v0 = vadd.f32 %v833_v60, %v761_v56  ;;  %vm901_vm14 = vcmp.eq.s32.totalorder %v1820_v46, %v1707_v21  ;;  %vm902_vm15 = vcmp.eq.s32.totalorder %v1825_v51, %v1707_v21 }
  0x35   : > { %1540 = vmatprep.subr.bf16.mxu1 %v1539_v57  ;;  %v937_v7 = vsel %vm901_vm14, %v1710_v22, 0.0  ;;  %v571_v8 = vadd.s32 176, %v1649_v2  ;;  %v572_v10 = vadd.s32 184, %v1649_v2  ;;  %v938_v12 = vsel %vm902_vm15, %v1710_v22, 0.0 }
  0x36   : > { %v866_v11 = vadd.f32 %v834_v63, %v762_v61  ;;  %v969_v13 = vadd.f32 %v937_v7, %v865_v0  ;;  %v1854_v23 = vadd.s32 48, %v1649_v2  ;;  %v1871_v35 = vadd.s32 56, %v1649_v2 }
  0x37   : > { %vm607_vm0 = vcmp.eq.s32.totalorder %v571_v8, %v1689_v15  ;;  %vm608_vm1 = vcmp.eq.s32.totalorder %v572_v10, %v1689_v15  ;;  %vm711_vm2 = vcmp.eq.s32.totalorder %v571_v8, %v1695_v17  ;;  %vm712_vm3 = vcmp.eq.s32.totalorder %v572_v10, %v1695_v17 }
  0x38   : > { %v970_v24 = vadd.f32 %v938_v12, %v866_v11  ;;  %v643_v25 = vsel %vm607_vm0, %v1692_v16, 0.0  ;;  %v644_v26 = vsel %vm608_vm1, %v1692_v16, 0.0  ;;  %v747_v27 = vsel %vm711_vm2, %v1698_v18, 0.0 }
  0x39   : > { %v748_v28 = vsel %vm712_vm3, %v1698_v18, 0.0  ;;  %v779_v29 = vadd.f32 %v747_v27, %v643_v25  ;;  %vm815_vm4 = vcmp.eq.s32.totalorder %v571_v8, %v1701_v19  ;;  %vm816_vm5 = vcmp.eq.s32.totalorder %v572_v10, %v1701_v19 }
  0x3a   : > { %v1541_v30 = vpack.c.bf16 %v970_v24, %v969_v13  ;;  %v780_v31 = vadd.f32 %v748_v28, %v644_v26  ;;  %v851_v32 = vsel %vm815_vm4, %v1704_v20, 0.0  ;;  %v852_v33 = vsel %vm816_vm5, %v1704_v20, 0.0 }
  0x3b   : > { %v883_v34 = vadd.f32 %v851_v32, %v779_v29  ;;  %vm919_vm6 = vcmp.eq.s32.totalorder %v571_v8, %v1707_v21  ;;  %vm920_vm7 = vcmp.eq.s32.totalorder %v572_v10, %v1707_v21  ;;  %vm591_vm8 = vcmp.eq.s32.totalorder %v1854_v23, %v1689_v15 }
  0x3c   : > { %1542 = vmatpush3.bf16.msra.mxu1 %v1541_v30  ;;  %v884_v36 = vadd.f32 %v852_v33, %v780_v31  ;;  %v955_v37 = vsel %vm919_vm6, %v1710_v22, 0.0  ;;  %v956_v38 = vsel %vm920_vm7, %v1710_v22, 0.0  ;;  %vm592_vm9 = vcmp.eq.s32.totalorder %v1871_v35, %v1689_v15 }
  0x3d   : > { %v987_v39 = vadd.f32 %v955_v37, %v883_v34  ;;  %v627_v40 = vsel %vm591_vm8, %v1692_v16, 0.0  ;;  %vm695_vm10 = vcmp.eq.s32.totalorder %v1854_v23, %v1695_v17  ;;  %v628_v42 = vsel %vm592_vm9, %v1692_v16, 0.0 }
  0x3e   : > { %v988_v41 = vadd.f32 %v956_v38, %v884_v36  ;;  %vm696_vm11 = vcmp.eq.s32.totalorder %v1871_v35, %v1695_v17  ;;  %v731_v43 = vsel %vm695_vm10, %v1698_v18, 0.0  ;;  %vm799_vm12 = vcmp.eq.s32.totalorder %v1854_v23, %v1701_v19 }
  0x3f   : > { %v732_v44 = vsel %vm696_vm11, %v1698_v18, 0.0  ;;  %v763_v45 = vadd.f32 %v731_v43, %v627_v40  ;;  %vm800_vm13 = vcmp.eq.s32.totalorder %v1871_v35, %v1701_v19  ;;  %v835_v49 = vsel %vm799_vm12, %v1704_v20, 0.0 }
  0x40   : > { %v1543_v47 = vpack.c.bf16 %v988_v41, %v987_v39  ;;  %v764_v48 = vadd.f32 %v732_v44, %v628_v42  ;;  %v836_v50 = vsel %vm800_vm13, %v1704_v20, 0.0  ;;  %vm903_vm14 = vcmp.eq.s32.totalorder %v1854_v23, %v1707_v21 }
  0x41   : > { %v867_v52 = vadd.f32 %v835_v49, %v763_v45  ;;  %vm904_vm15 = vcmp.eq.s32.totalorder %v1871_v35, %v1707_v21  ;;  %v573_v53 = vadd.s32 192, %v1649_v2  ;;  %v939_v55 = vsel %vm903_vm14, %v1710_v22, 0.0 }
  0x42   : > { %1544 = vmatprep.subr.bf16.mxu1 %v1543_v47  ;;  %v868_v54 = vadd.f32 %v836_v50, %v764_v48  ;;  %v940_v56 = vsel %vm904_vm15, %v1710_v22, 0.0  ;;  %v574_v57 = vadd.s32 200, %v1649_v2  ;;  %v557_v13 = vadd.s32 64, %v1649_v2 }
  0x43   : > { %v971_v58 = vadd.f32 %v939_v55, %v867_v52  ;;  %vm609_vm0 = vcmp.eq.s32.totalorder %v573_v53, %v1689_v15  ;;  %vm713_vm1 = vcmp.eq.s32.totalorder %v573_v53, %v1695_v17  ;;  %vm817_vm2 = vcmp.eq.s32.totalorder %v573_v53, %v1701_v19 }
  0x44   : > { %v972_v59 = vadd.f32 %v940_v56, %v868_v54  ;;  %vm610_vm3 = vcmp.eq.s32.totalorder %v574_v57, %v1689_v15  ;;  %v645_v60 = vsel %vm609_vm0, %v1692_v16, 0.0  ;;  %vm714_vm4 = vcmp.eq.s32.totalorder %v574_v57, %v1695_v17 }
  0x45   : > { %v646_v61 = vsel %vm610_vm3, %v1692_v16, 0.0  ;;  %v749_v63 = vsel %vm713_vm1, %v1698_v18, 0.0  ;;  %v750_v0 = vsel %vm714_vm4, %v1698_v18, 0.0  ;;  %vm818_vm5 = vcmp.eq.s32.totalorder %v574_v57, %v1701_v19 }
  0x46   : > { %v1545_v7 = vpack.c.bf16 %v972_v59, %v971_v58  ;;  %v781_v8 = vadd.f32 %v749_v63, %v645_v60  ;;  %v782_v10 = vadd.f32 %v750_v0, %v646_v61  ;;  %v853_v11 = vsel %vm817_vm2, %v1704_v20, 0.0 }
  0x47   : > { %v854_v12 = vsel %vm818_vm5, %v1704_v20, 0.0  ;;  %vm921_vm6 = vcmp.eq.s32.totalorder %v573_v53, %v1707_v21  ;;  %vm922_vm7 = vcmp.eq.s32.totalorder %v574_v57, %v1707_v21  ;;  %v558_v28 = vadd.s32 72, %v1649_v2 }
  0x48   : > { %1546 = vmatpush3.bf16.msra.mxu1 %v1545_v7  ;;  %v885_v24 = vadd.f32 %v853_v11, %v781_v8  ;;  %v886_v25 = vadd.f32 %v854_v12, %v782_v10  ;;  %v957_v26 = vsel %vm921_vm6, %v1710_v22, 0.0  ;;  %v958_v27 = vsel %vm922_vm7, %v1710_v22, 0.0 }
  0x49   : > { %vm593_vm8 = vcmp.eq.s32.totalorder %v557_v13, %v1689_v15  ;;  %vm697_vm9 = vcmp.eq.s32.totalorder %v557_v13, %v1695_v17  ;;  %vm801_vm10 = vcmp.eq.s32.totalorder %v557_v13, %v1701_v19  ;;  %vm594_vm11 = vcmp.eq.s32.totalorder %v558_v28, %v1689_v15 }
  0x4a   : > { %v989_v29 = vadd.f32 %v957_v26, %v885_v24  ;;  %v990_v30 = vadd.f32 %v958_v27, %v886_v25  ;;  %v629_v31 = vsel %vm593_vm8, %v1692_v16, 0.0  ;;  %v733_v32 = vsel %vm697_vm9, %v1698_v18, 0.0  ;;  %v416_v25 = vld [vmem:[%s390_s20] sm:$0xf] }
  0x4b   : > { %vm698_vm12 = vcmp.eq.s32.totalorder %v558_v28, %v1695_v17  ;;  %v765_v33 = vadd.f32 %v733_v32, %v629_v31  ;;  %vm802_vm13 = vcmp.eq.s32.totalorder %v558_v28, %v1701_v19  ;;  %v630_v36 = vsel %vm594_vm11, %v1692_v16, 0.0 }
  0x4c   : > { %v1547_v34 = vpack.c.bf16 %v990_v30, %v989_v29  ;;  %v734_v37 = vsel %vm698_vm12, %v1698_v18, 0.0  ;;  %v837_v38 = vsel %vm801_vm10, %v1704_v20, 0.0  ;;  %v838_v40 = vsel %vm802_vm13, %v1704_v20, 0.0 }
  0x4d   : > { %v766_v39 = vadd.f32 %v734_v37, %v630_v36  ;;  %v869_v41 = vadd.f32 %v837_v38, %v765_v33  ;;  %vm905_vm14 = vcmp.eq.s32.totalorder %v557_v13, %v1707_v21  ;;  %vm906_vm15 = vcmp.eq.s32.totalorder %v558_v28, %v1707_v21  ;;  %v417_v28 = vld [vmem:[%s394_s23] sm:$0xf] }
  0x4e   : > { %1548 = vmatprep.subr.bf16.mxu1 %v1547_v34  ;;  %v941_v42 = vsel %vm905_vm14, %v1710_v22, 0.0  ;;  %v575_v43 = vadd.s32 208, %v1649_v2  ;;  %v576_v44 = vadd.s32 216, %v1649_v2  ;;  %v942_v47 = vsel %vm906_vm15, %v1710_v22, 0.0 }
  0x4f   : > { %v870_v45 = vadd.f32 %v838_v40, %v766_v39  ;;  %v973_v48 = vadd.f32 %v941_v42, %v869_v41  ;;  %v559_v49 = vadd.s32 80, %v1649_v2  ;;  %v560_v63 = vadd.s32 88, %v1649_v2 }
  0x50   : > { %vm611_vm0 = vcmp.eq.s32.totalorder %v575_v43, %v1689_v15  ;;  %vm612_vm1 = vcmp.eq.s32.totalorder %v576_v44, %v1689_v15  ;;  %vm715_vm2 = vcmp.eq.s32.totalorder %v575_v43, %v1695_v17  ;;  %vm716_vm3 = vcmp.eq.s32.totalorder %v576_v44, %v1695_v17 }
  0x51   : > { %v974_v50 = vadd.f32 %v942_v47, %v870_v45  ;;  %v647_v52 = vsel %vm611_vm0, %v1692_v16, 0.0  ;;  %v648_v53 = vsel %vm612_vm1, %v1692_v16, 0.0  ;;  %v751_v54 = vsel %vm715_vm2, %v1698_v18, 0.0 }
  0x52   : > { %v752_v55 = vsel %vm716_vm3, %v1698_v18, 0.0  ;;  %v783_v56 = vadd.f32 %v751_v54, %v647_v52  ;;  %vm819_vm4 = vcmp.eq.s32.totalorder %v575_v43, %v1701_v19  ;;  %vm820_vm5 = vcmp.eq.s32.totalorder %v576_v44, %v1701_v19 }
  0x53   : > { %v1549_v57 = vpack.c.bf16 %v974_v50, %v973_v48  ;;  %v784_v58 = vadd.f32 %v752_v55, %v648_v53  ;;  %v855_v59 = vsel %vm819_vm4, %v1704_v20, 0.0  ;;  %v856_v60 = vsel %vm820_vm5, %v1704_v20, 0.0 }
  0x54   : > { %v887_v61 = vadd.f32 %v855_v59, %v783_v56  ;;  %vm923_vm6 = vcmp.eq.s32.totalorder %v575_v43, %v1707_v21  ;;  %vm924_vm7 = vcmp.eq.s32.totalorder %v576_v44, %v1707_v21  ;;  %vm595_vm8 = vcmp.eq.s32.totalorder %v559_v49, %v1689_v15 }
  0x55   : > { %1550 = vmatpush3.bf16.msra.mxu1 %v1549_v57  ;;  %v888_v0 = vadd.f32 %v856_v60, %v784_v58  ;;  %v959_v7 = vsel %vm923_vm6, %v1710_v22, 0.0  ;;  %v960_v8 = vsel %vm924_vm7, %v1710_v22, 0.0  ;;  %vm596_vm9 = vcmp.eq.s32.totalorder %v560_v63, %v1689_v15 }
  0x56   : > { %v991_v10 = vadd.f32 %v959_v7, %v887_v61  ;;  %v631_v11 = vsel %vm595_vm8, %v1692_v16, 0.0  ;;  %vm699_vm10 = vcmp.eq.s32.totalorder %v559_v49, %v1695_v17  ;;  %v632_v13 = vsel %vm596_vm9, %v1692_v16, 0.0 }
  0x57   : > { %v992_v12 = vadd.f32 %v960_v8, %v888_v0  ;;  %vm700_vm11 = vcmp.eq.s32.totalorder %v560_v63, %v1695_v17  ;;  %v735_v24 = vsel %vm699_vm10, %v1698_v18, 0.0  ;;  %vm803_vm12 = vcmp.eq.s32.totalorder %v559_v49, %v1701_v19 }
  0x58   : > { %v736_v26 = vsel %vm700_vm11, %v1698_v18, 0.0  ;;  %v767_v27 = vadd.f32 %v735_v24, %v631_v11  ;;  %vm804_vm13 = vcmp.eq.s32.totalorder %v560_v63, %v1701_v19  ;;  %v839_v31 = vsel %vm803_vm12, %v1704_v20, 0.0 }
  0x59   : > { %v1551_v29 = vpack.c.bf16 %v992_v12, %v991_v10  ;;  %v768_v30 = vadd.f32 %v736_v26, %v632_v13  ;;  %v840_v32 = vsel %vm804_vm13, %v1704_v20, 0.0  ;;  %vm907_vm14 = vcmp.eq.s32.totalorder %v559_v49, %v1707_v21 }
  0x5a   : > { %v871_v33 = vadd.f32 %v839_v31, %v767_v27  ;;  %vm908_vm15 = vcmp.eq.s32.totalorder %v560_v63, %v1707_v21  ;;  %v1978_v34 = vrot.slane %v416_v25, %v1655_v3  ;;  %v943_v37 = vsel %vm907_vm14, %v1710_v22, 0.0 }
  0x5b   : > { %1552 = vmatprep.subr.bf16.mxu1 %v1551_v29  ;;  %v872_v36 = vadd.f32 %v840_v32, %v768_v30  ;;  %v944_v38 = vsel %vm908_vm15, %v1710_v22, 0.0  ;;  %v1983_v39 = vrot.slane %v417_v28, %v1655_v3  ;;  %v1990_v41 = vrot.slane %v416_v25, %v1658_v4 }
  0x5c   : > { %v975_v40 = vadd.f32 %v943_v37, %v871_v33  ;;  %vm431_vm0 = vcmp.eq.s32.totalorder %v1649_v2, %v1978_v34  ;;  %vm432_vm1 = vcmp.eq.s32.totalorder %v1677_v9, %v1978_v34  ;;  %v1995_v45 = vrot.slane %v417_v28, %v1658_v4 }
  0x5d   : > { %v976_v42 = vadd.f32 %v944_v38, %v872_v36  ;;  %v443_v43 = vsel %vm431_vm0, %v1983_v39, 0.0  ;;  %v444_v44 = vsel %vm432_vm1, %v1983_v39, 0.0  ;;  %vm463_vm2 = vcmp.eq.s32.totalorder %v1649_v2, %v1990_v41 }
  0x5e   : > { %vm464_vm3 = vcmp.eq.s32.totalorder %v1677_v9, %v1990_v41  ;;  %v2002_v3 = vrot.slane %v416_v25, %v1661_v5  ;;  %v2005_v47 = vrot.slane %v417_v28, %v1661_v5  ;;  %v475_v49 = vsel %vm463_vm2, %v1995_v45, 0.0 }
  0x5f   : > { %v1553_v48 = vpack.c.bf16 %v976_v42, %v975_v40  ;;  %v476_v50 = vsel %vm464_vm3, %v1995_v45, 0.0  ;;  %v2010_v4 = vrot.slane %v416_v25, %v1664_v6  ;;  %v483_v52 = vadd.f32 %v475_v49, %v443_v43 }
  0x60   : > { %v484_v53 = vadd.f32 %v476_v50, %v444_v44  ;;  %vm495_vm4 = vcmp.eq.s32.totalorder %v1649_v2, %v2002_v3  ;;  %vm496_vm5 = vcmp.eq.s32.totalorder %v1677_v9, %v2002_v3  ;;  %v2023_v57 = vrot.slane %v417_v28, %v1664_v6 }
  0x61   : > { %1554 = vmatpush3.bf16.msra.mxu1 %v1553_v48  ;;  %v507_v5 = vsel %vm495_vm4, %v2005_v47, 0.0  ;;  %v508_v54 = vsel %vm496_vm5, %v2005_v47, 0.0  ;;  %vm527_vm6 = vcmp.eq.s32.totalorder %v1649_v2, %v2010_v4  ;;  %vm528_vm7 = vcmp.eq.s32.totalorder %v1677_v9, %v2010_v4 }
  0x62   : > { %v515_v55 = vadd.f32 %v507_v5, %v483_v52  ;;  %v516_v56 = vadd.f32 %v508_v54, %v484_v53  ;;  %v577_v58 = vadd.s32 224, %v1649_v2  ;;  %v578_v59 = vadd.s32 232, %v1649_v2 }
  0x63   : > { %v561_v60 = vadd.s32 96, %v1649_v2  ;;  %v562_v61 = vadd.s32 104, %v1649_v2  ;;  %v539_v63 = vsel %vm527_vm6, %v2023_v57, 0.0  ;;  %v540_v0 = vsel %vm528_vm7, %v2023_v57, 0.0 }
  0x64   : > { %vm613_vm8 = vcmp.eq.s32.totalorder %v577_v58, %v1689_v15  ;;  %vm717_vm9 = vcmp.eq.s32.totalorder %v577_v58, %v1695_v17  ;;  %v547_v9 = vadd.f32 %v539_v63, %v515_v55  ;;  %v548_v7 = vadd.f32 %v540_v0, %v516_v56 }
  0x65   : > { %vm614_vm10 = vcmp.eq.s32.totalorder %v578_v59, %v1689_v15  ;;  %v649_v6 = vsel %vm613_vm8, %v1692_v16, 0.0  ;;  %vm433_vm11 = vcmp.eq.s32.totalorder %v1686_v14, %v1978_v34  ;;  %vm718_vm12 = vcmp.eq.s32.totalorder %v578_v59, %v1695_v17 }
  0x66   : > { %v650_v8 = vsel %vm614_vm10, %v1692_v16, 0.0  ;;  %v753_v10 = vsel %vm717_vm9, %v1698_v18, 0.0  ;;  %vm821_vm13 = vcmp.eq.s32.totalorder %v577_v58, %v1701_v19  ;;  %v1520_v11 = vpack.c.bf16 %v548_v7, %v547_v9 }
  0x67   : > { %v754_v12 = vsel %vm718_vm12, %v1698_v18, 0.0  ;;  %v785_v13 = vadd.f32 %v753_v10, %v649_v6  ;;  %vm822_vm14 = vcmp.eq.s32.totalorder %v578_v59, %v1701_v19  ;;  %v857_v25 = vsel %vm821_vm13, %v1704_v20, 0.0 }
  0x68   : > { %v786_v24 = vadd.f32 %v754_v12, %v650_v8  ;;  %v858_v26 = vsel %vm822_vm14, %v1704_v20, 0.0  ;;  %vm925_vm15 = vcmp.eq.s32.totalorder %v577_v58, %v1707_v21  ;;  %1521 = vmatpush3.bf16.msra.mxu0 %v1520_v11  ;;  %vm926_vm0 = vcmp.eq.s32.totalorder %v578_v59, %v1707_v21 }
  0x69   : > { %v889_v27 = vadd.f32 %v857_v25, %v785_v13  ;;  %v961_v28 = vsel %vm925_vm15, %v1710_v22, 0.0  ;;  %vm597_vm1 = vcmp.eq.s32.totalorder %v561_v60, %v1689_v15  ;;  %v962_v30 = vsel %vm926_vm0, %v1710_v22, 0.0  ;;  %1522 = vmatprep.subr.bf16.mxu0 %v1584_v1 }
  0x6a   : > { %v890_v29 = vadd.f32 %v858_v26, %v786_v24  ;;  %vm598_vm2 = vcmp.eq.s32.totalorder %v562_v61, %v1689_v15  ;;  %v633_v31 = vsel %vm597_vm1, %v1692_v16, 0.0  ;;  %vm701_vm3 = vcmp.eq.s32.totalorder %v561_v60, %v1695_v17 }
  0x6b   : > { %v993_v32 = vadd.f32 %v961_v28, %v889_v27  ;;  %v634_v33 = vsel %vm598_vm2, %v1692_v16, 0.0  ;;  %vm702_vm4 = vcmp.eq.s32.totalorder %v562_v61, %v1695_v17  ;;  %v737_v37 = vsel %vm701_vm3, %v1698_v18, 0.0 }
  0x6c   : > { %v994_v36 = vadd.f32 %v962_v30, %v890_v29  ;;  %v738_v38 = vsel %vm702_vm4, %v1698_v18, 0.0  ;;  %vm805_vm5 = vcmp.eq.s32.totalorder %v561_v60, %v1701_v19  ;;  %v769_v40 = vadd.f32 %v737_v37, %v633_v31 }
  0x6d   : > { %v770_v42 = vadd.f32 %v738_v38, %v634_v33  ;;  %vm806_vm6 = vcmp.eq.s32.totalorder %v562_v61, %v1701_v19  ;;  %v841_v43 = vsel %vm805_vm5, %v1704_v20, 0.0  ;;  %vm909_vm7 = vcmp.eq.s32.totalorder %v561_v60, %v1707_v21 }
  0x6e   : > { %v1555_v44 = vpack.c.bf16 %v994_v36, %v993_v32  ;;  %v842_v48 = vsel %vm806_vm6, %v1704_v20, 0.0  ;;  %vm910_vm8 = vcmp.eq.s32.totalorder %v562_v61, %v1707_v21  ;;  %v873_v49 = vadd.f32 %v841_v43, %v769_v40 }
  0x6f   : > { %v874_v50 = vadd.f32 %v842_v48, %v770_v42  ;;  %v945_v52 = vsel %vm909_vm7, %v1710_v22, 0.0  ;;  %v946_v53 = vsel %vm910_vm8, %v1710_v22, 0.0  ;;  %vm434_vm9 = vcmp.eq.s32.totalorder %v1775_v62, %v1978_v34 }
  0x70   : > { %1556 = vmatprep.subr.bf16.mxu1 %v1555_v44  ;;  %v445_v5 = vsel %vm433_vm11, %v1983_v39, 0.0  ;;  %vm465_vm10 = vcmp.eq.s32.totalorder %v1686_v14, %v1990_v41  ;;  %vm466_vm12 = vcmp.eq.s32.totalorder %v1775_v62, %v1990_v41  ;;  %v977_v54 = vadd.f32 %v945_v52, %v873_v49 }
  0x71   : > { %v978_v55 = vadd.f32 %v946_v53, %v874_v50  ;;  %v446_v56 = vsel %vm434_vm9, %v1983_v39, 0.0  ;;  %v477_v58 = vsel %vm465_vm10, %v1995_v45, 0.0  ;;  %v478_v59 = vsel %vm466_vm12, %v1995_v45, 0.0 }
  0x72   : > { %v485_v60 = vadd.f32 %v477_v58, %v445_v5  ;;  %vm497_vm13 = vcmp.eq.s32.totalorder %v1686_v14, %v2002_v3  ;;  %vm498_vm11 = vcmp.eq.s32.totalorder %v1775_v62, %v2002_v3  ;;  %v486_v63 = vadd.f32 %v478_v59, %v446_v56 }
  0x73   : > { %v1557_v61 = vpack.c.bf16 %v978_v55, %v977_v54  ;;  %v509_v0 = vsel %vm497_vm13, %v2005_v47, 0.0  ;;  %v510_v9 = vsel %vm498_vm11, %v2005_v47, 0.0  ;;  %vm529_vm14 = vcmp.eq.s32.totalorder %v1686_v14, %v2010_v4 }
  0x74   : > { %v517_v7 = vadd.f32 %v509_v0, %v485_v60  ;;  %vm530_vm15 = vcmp.eq.s32.totalorder %v1775_v62, %v2010_v4  ;;  %v579_v6 = vadd.s32 240, %v1649_v2  ;;  %v518_v8 = vadd.f32 %v510_v9, %v486_v63 }
  0x75   : > { %1558 = vmatpush3.bf16.msra.mxu1 %v1557_v61  ;;  %v541_v10 = vsel %vm529_vm14, %v2023_v57, 0.0  ;;  %v542_v11 = vsel %vm530_vm15, %v2023_v57, 0.0  ;;  %v580_v12 = vadd.s32 248, %v1649_v2  ;;  %v563_v32 = vadd.s32 112, %v1649_v2 }
  0x76   : > { %v549_v13 = vadd.f32 %v541_v10, %v517_v7  ;;  %vm615_vm0 = vcmp.eq.s32.totalorder %v579_v6, %v1689_v15  ;;  %vm719_vm1 = vcmp.eq.s32.totalorder %v579_v6, %v1695_v17  ;;  %vm823_vm2 = vcmp.eq.s32.totalorder %v579_v6, %v1701_v19 }
  0x77   : > { %v550_v14 = vadd.f32 %v542_v11, %v518_v8  ;;  %vm616_vm3 = vcmp.eq.s32.totalorder %v580_v12, %v1689_v15  ;;  %v651_v62 = vsel %vm615_vm0, %v1692_v16, 0.0  ;;  %vm720_vm4 = vcmp.eq.s32.totalorder %v580_v12, %v1695_v17 }
  0x78   : > { %v652_v24 = vsel %vm616_vm3, %v1692_v16, 0.0  ;;  %v755_v25 = vsel %vm719_vm1, %v1698_v18, 0.0  ;;  %v756_v26 = vsel %vm720_vm4, %v1698_v18, 0.0  ;;  %vm824_vm5 = vcmp.eq.s32.totalorder %v580_v12, %v1701_v19 }
  0x79   : > { %v1523_v27 = vpack.c.bf16 %v550_v14, %v549_v13  ;;  %v787_v28 = vadd.f32 %v755_v25, %v651_v62  ;;  %v788_v29 = vadd.f32 %v756_v26, %v652_v24  ;;  %v859_v30 = vsel %vm823_vm2, %v1704_v20, 0.0 }
  0x7a   : > { %v860_v31 = vsel %vm824_vm5, %v1704_v20, 0.0  ;;  %vm927_vm6 = vcmp.eq.s32.totalorder %v579_v6, %v1707_v21  ;;  %vm928_vm7 = vcmp.eq.s32.totalorder %v580_v12, %v1707_v21  ;;  %v564_v40 = vadd.s32 120, %v1649_v2 }
  0x7b   : > { %1524 = vmatpush3.bf16.msra.mxu0 %v1523_v27  ;;  %v891_v33 = vadd.f32 %v859_v30, %v787_v28  ;;  %v892_v36 = vadd.f32 %v860_v31, %v788_v29  ;;  %v963_v37 = vsel %vm927_vm6, %v1710_v22, 0.0  ;;  %v964_v38 = vsel %vm928_vm7, %v1710_v22, 0.0 }
  0x7c   : > { %vm599_vm8 = vcmp.eq.s32.totalorder %v563_v32, %v1689_v15  ;;  %vm703_vm9 = vcmp.eq.s32.totalorder %v563_v32, %v1695_v17  ;;  %vm807_vm10 = vcmp.eq.s32.totalorder %v563_v32, %v1701_v19  ;;  %1525 = vmatprep.subr.bf16.mxu0 %v1584_v1  ;;  %vm600_vm12 = vcmp.eq.s32.totalorder %v564_v40, %v1689_v15 }
  0x7d   : > { %v995_v42 = vadd.f32 %v963_v37, %v891_v33  ;;  %v996_v43 = vadd.f32 %v964_v38, %v892_v36  ;;  %v635_v44 = vsel %vm599_vm8, %v1692_v16, 0.0  ;;  %v739_v48 = vsel %vm703_vm9, %v1698_v18, 0.0  ;;  %v1147_v33 = vld [vmem:[%s2211_s7] sm:$0x7] }
  0x7e   : > { %vm704_vm13 = vcmp.eq.s32.totalorder %v564_v40, %v1695_v17  ;;  %v771_v2 = vadd.f32 %v739_v48, %v635_v44  ;;  %vm808_vm11 = vcmp.eq.s32.totalorder %v564_v40, %v1701_v19  ;;  %v636_v50 = vsel %vm600_vm12, %v1692_v16, 0.0  ;;  %v1146_v36 = vld [vmem:[%s2210_s6] sm:$0x7] }
  0x7f   : > { %v1559_v49 = vpack.c.bf16 %v996_v43, %v995_v42  ;;  %v740_v52 = vsel %vm704_vm13, %v1698_v18, 0.0  ;;  %v843_v53 = vsel %vm807_vm10, %v1704_v20, 0.0  ;;  %v844_v54 = vsel %vm808_vm11, %v1704_v20, 0.0 }
  0x80   : > { %v772_v5 = vadd.f32 %v740_v52, %v636_v50  ;;  %v875_v55 = vadd.f32 %v843_v53, %v771_v2  ;;  %vm911_vm14 = vcmp.eq.s32.totalorder %v563_v32, %v1707_v21  ;;  %vm912_vm15 = vcmp.eq.s32.totalorder %v564_v40, %v1707_v21  ;;  %v1073_v21 = vld [vmem:[%s411_s27] sm:$0xff] }
  0x81   : > { %1560 = vmatprep.subr.bf16.mxu1 %v1559_v49  ;;  %v947_v15 = vsel %vm911_vm14, %v1710_v22, 0.0  ;;  %vm435_vm0 = vcmp.eq.s32.totalorder %v1820_v46, %v1978_v34  ;;  %vm436_vm1 = vcmp.eq.s32.totalorder %v1825_v51, %v1978_v34  ;;  %v948_v17 = vsel %vm912_vm15, %v1710_v22, 0.0 }
  0x82   : > { %v876_v16 = vadd.f32 %v844_v54, %v772_v5  ;;  %v979_v18 = vadd.f32 %v947_v15, %v875_v55  ;;  %v447_v19 = vsel %vm435_vm0, %v1983_v39, 0.0  ;;  %v448_v20 = vsel %vm436_vm1, %v1983_v39, 0.0 }
  0x83   : > { %vm467_vm2 = vcmp.eq.s32.totalorder %v1820_v46, %v1990_v41  ;;  %vm468_vm3 = vcmp.eq.s32.totalorder %v1825_v51, %v1990_v41  ;;  %vm499_vm4 = vcmp.eq.s32.totalorder %v1820_v46, %v2002_v3  ;;  %vm500_vm5 = vcmp.eq.s32.totalorder %v1825_v51, %v2002_v3 }
  0x84   : > { %v980_v56 = vadd.f32 %v948_v17, %v876_v16  ;;  %v479_v58 = vsel %vm467_vm2, %v1995_v45, 0.0  ;;  %v480_v22 = vsel %vm468_vm3, %v1995_v45, 0.0  ;;  %v511_v61 = vsel %vm499_vm4, %v2005_v47, 0.0 }
  0x85   : > { %v487_v59 = vadd.f32 %v479_v58, %v447_v19  ;;  %v488_v60 = vadd.f32 %v480_v22, %v448_v20  ;;  %v512_v63 = vsel %vm500_vm5, %v2005_v47, 0.0  ;;  %vm531_vm6 = vcmp.eq.s32.totalorder %v1820_v46, %v2010_v4 }
  0x86   : > { %v1561_v0 = vpack.c.bf16 %v980_v56, %v979_v18  ;;  %vm532_vm7 = vcmp.eq.s32.totalorder %v1825_v51, %v2010_v4  ;;  %v1074_v9 = vunpack.c.l.bf16 %v1073_v21  ;;  %v543_v8 = vsel %vm531_vm6, %v2023_v57, 0.0 }
  0x87   : > { %v519_v7 = vadd.f32 %v511_v61, %v487_v59  ;;  %v520_v6 = vadd.f32 %v512_v63, %v488_v60  ;;  %v544_v10 = vsel %vm532_vm7, %v2023_v57, 0.0  ;;  %v1075_v11 = vunpack.c.h.bf16 %v1073_v21 }
  0x88   : > { %1562 = vmatpush3.bf16.msra.mxu1 %v1561_v0  ;;  %vm437_vm8 = vcmp.eq.s32.totalorder %v1854_v23, %v1978_v34  ;;  %vm438_vm9 = vcmp.eq.s32.totalorder %v1871_v35, %v1978_v34  ;;  %vm469_vm10 = vcmp.eq.s32.totalorder %v1854_v23, %v1990_v41  ;;  %vm470_vm12 = vcmp.eq.s32.totalorder %v1871_v35, %v1990_v41 }
  0x89   : > { %v551_v46 = vadd.f32 %v543_v8, %v519_v7  ;;  %v552_v51 = vadd.f32 %v544_v10, %v520_v6  ;;  %v449_v12 = vsel %vm437_vm8, %v1983_v39, 0.0  ;;  %v450_v13 = vsel %vm438_vm9, %v1983_v39, 0.0  ;;  %1140 = vmatprep.mubr.f32.mxu1 %v1075_v11 }
  0x8a   : > { %v481_v14 = vsel %vm469_vm10, %v1995_v45, 0.0  ;;  %vm501_vm13 = vcmp.eq.s32.totalorder %v1854_v23, %v2002_v3  ;;  %vm502_vm11 = vcmp.eq.s32.totalorder %v1871_v35, %v2002_v3  ;;  %v482_v62 = vsel %vm470_vm12, %v1995_v45, 0.0 }
  0x8b   : > { %v1526_v34 = vpack.c.bf16 %v552_v51, %v551_v46  ;;  %1141 = vmatmul.mubr.f32.vlgmr.msra.gmra.mrb[0].mxu1 %v1074_v9  ;;  %v489_v24 = vadd.f32 %v481_v14, %v449_v12  ;;  %v513_v39 = vsel %vm501_vm13, %v2005_v47, 0.0  ;;  %v490_v25 = vadd.f32 %v482_v62, %v450_v13 }
  0x8c   : > { %v514_v26 = vsel %vm502_vm11, %v2005_v47, 0.0  ;;  %vm533_vm14 = vcmp.eq.s32.totalorder %v1854_v23, %v2010_v4  ;;  %vm534_vm15 = vcmp.eq.s32.totalorder %v1871_v35, %v2010_v4  ;;  %vm1585_vm0 = vmmov 0   ;;  %v997_v35 = vld [vmem:[%s406_s12] sm:$0x3] }
  0x8d   : > { %1527 = vmatpush3.bf16.msra.mxu0 %v1526_v34  ;;  %v521_v41 = vadd.f32 %v513_v39, %v489_v24  ;;  %v545_v3 = vsel %vm533_vm14, %v2023_v57, 0.0  ;;  %v546_v27 = vsel %vm534_vm15, %v2023_v57, 0.0  ;;  %v522_v45 = vadd.f32 %v514_v26, %v490_v25 }
  0x8e   : > { %1528 = vmatprep.subr.bf16.mxu0 %v1584_v1  ;;  %v1586_v28 = vmov 0.0   ;;  %v998_v29 = vunpack.c.l.bf16 %v997_v35  ;;  %vm999_vm1 = vcmask 523264   ;;  %v1300_v1 = vld [vmem:[%s2212_s8] sm:$0x7]  ;;  %v1587_v57 = vmov 0  }
  0x8f   : > { %v553_v47 = vadd.f32 %v545_v3, %v521_v41  ;;  %1506 = vmatprep.mubr.msk.f32.mxu0 %vm1585_vm0, %v1586_v28  ;;  %v554_v23 = vadd.f32 %v546_v27, %v522_v45  ;;  %1575 = vset.pattern.permute.xlu0 %v1587_v57  ;;  %vm1148_vm2 = vcmask 64512   ;;  %vm1226_vm3 = vcmask 1042432  }
  0x90   : > { %1303 = vperm.xlu0 %1575, %v1300_v1   ;;  %vm1222_vm4 = vcmask 23552   ;;  %vm1307_vm5 = vcmask 26624  }
  0x91   : > { %v1529_v4 = vpack.c.bf16 %v554_v23, %v553_v47 }
  0x93   : > { %1530 = vmatpush3.bf16.msra.mxu0 %v1529_v4 }
  0x94   : > { %1509 = vmatprep.subr.mxu0 %v1586_v28 }
  0x96   : > { %1507 = vmatmul.mubr.msk.f32.vlgmr.msra.gmra.mrb[0].mxu0 %vm999_vm1, %v998_v29 }
  0x97   : > { %1511 = vmatprep.mubr.msk.f32.mxu0 %vm1585_vm0, %v1586_v28 }
 0x10f   : > { %v1304_v44 = vpop.permute.xlu0 %1303 }
 0x15e   : > { %v1483_v30 = vpop.f32.mrb[0].mxu1 }
 0x15f   : > { %v1484_v31 = vpop.f32.mrb[1].mxu1 }
 0x160   : > { %v1485_v32 = vadd.f32 %v1484_v31, %v1483_v30 }
 0x162   : > { %1510 = vmatpush3.msra.mxu0 %v1485_v32 }
 0x163   : > { %1512 = vmatmul.mubr.msk.f32.vlgmr.msra.gmra.mrb[2].mxu0 %vm1148_vm2, %v1147_v33  ;;  %1514 = vmatprep.subr.mxu0 %v1586_v28 }
 0x164   : > { %1516 = vmatprep.mubr.msk.f32.mxu0 %vm1585_vm0, %v1586_v28 }
 0x169   : > { %v1069_v37 = vpop.f32.mrb[0].mxu0 }
 0x16a   : > { %v1508_v38 = vpop.f32.mrb[1].mxu0  ;;  %1515 = vmatpush3.msk.msra.mxu0 %vm1226_vm3, %v1069_v37 }
 0x16b   : > { %1517 = vmatmul.mubr.msk.f32.vlgmr.msra.gmra.mrb[4].mxu0 %vm1222_vm4, %v1146_v36 }
 0x236   : > { %v1218_v40 = vpop.f32.mrb[2].mxu0 }
 0x237   : > { %v1513_v42 = vpop.f32.mrb[3].mxu0 }
 0x23e   : > { %v1296_v43 = vpop.f32.mrb[4].mxu0 }
 0x23f   : > { %v1297_v48 = vadd.f32 %v1296_v43, %v1218_v40  ;;  %v1518_v2 = vpop.f32.mrb[5].mxu0 }
 0x241   : > { %v1306_v49 = vadd.f32 %v1304_v44, %v1297_v48 }
 0x243   : > { %1308 = vst.msk [vmem:[%s415_s21] sm:$0x7] %vm1307_vm5, %v1306_v49 }
 0x244 PF: > { %s19_s30 = sadd.s32 1, %s1582_s30  }
 0x245   : > { %p16_p4 = scmp.ge.s32.totalorder %s19_s30, 4  }
 0x247   :  { %18 = sbr.rel (!%p16_p4) target bundleno = 1 (0x1), region = 101 }

</bundles_post_ra>
